<compile_context>
chip_gen: v7x
topology: tpu7x:2x2x1
jax: 0.10.0
libtpu: 0.0.40
codegen_flags: <defaults>
</compile_context>

<pallas_src>
import math

import jax
import jax.numpy as jnp
from jax import lax
from jax.experimental import pallas as pl
from jax.experimental.pallas import tpu as pltpu


def _make_kernel(T, T_out, D, H, DFF, stride, eps, HS):
    dk = D // H
    inv_sqrt_dk = 1.0 / math.sqrt(dk)
    f32 = jnp.float32
    bf16 = jnp.bfloat16
    pad_tail = HS - 8 - T          # rows after the h1 slab that must stay zero

    def kernel(x_ref, mask_ref,
               ln1_a_ref, ln1_b_ref,
               wqkv_ref, bqkv_ref, wo_ref, bo_ref,
               ln2_a_ref, ln2_b_ref,
               w1_ref, b1_ref, w2_ref, b2_ref,
               out_ref,
               ctx_scr, x1_scr, h_scr):
        x = x_ref[0]                              # (T, D)  f32
        # one bf16->f32 cast per grid step (hoisted out of the head loop)
        addmask = mask_ref[0].astype(f32)         # (T, T)  0 where valid / -1e9 masked

        def layer_norm(v, a_ref, b_ref):
            mean = jnp.mean(v, axis=-1, keepdims=True)
            # torch.Tensor.std default is unbiased (divide by N-1)
            var = jnp.sum((v - mean) ** 2, axis=-1, keepdims=True) * (1.0 / (D - 1))
            std = jnp.sqrt(var)
            return a_ref[...] * (v - mean) / (std + eps) + b_ref[...]

        # ---------- sublayer[0]: x + self_attn(LN(x)) ----------
        y16 = layer_norm(x, ln1_a_ref, ln1_b_ref).astype(bf16)       # (T, D) bf16

        # Per-head fused QKV projection (one (D, 3*dk) matmul per head).  Each
        # head's context is written to its column block of ctx_scr so ONE
        # full-K (T,D)@(D,D) output projection runs after the loop.
        # TODO(synk): for large H switch to lax.fori_loop over a head-major
        #             scratch to bound live ranges.
        for h in range(H):
            qkv = (jnp.dot(y16, wqkv_ref[h], preferred_element_type=f32)
                   + bqkv_ref[h])                                     # (T, 3*dk) f32
            # scale folded into q in f32 (removes the (T,T) scale)
            qh = (qkv[:, 0:dk] * inv_sqrt_dk).astype(bf16)
            kh = qkv[:, dk:2 * dk].astype(bf16)
            vh = qkv[:, 2 * dk:3 * dk].astype(bf16)

            # scores = q @ k.T  (contract dk, no explicit transpose)
            s = lax.dot_general(qh, kh, (((1,), (1,)), ((), ())),
                                preferred_element_type=f32)           # (T, T)
            s = s + addmask
            m = jnp.max(s, axis=-1, keepdims=True)
            e = jnp.exp(s - m)
            p = e * pl.reciprocal(jnp.sum(e, axis=-1, keepdims=True), approx=True)

            ctx = jnp.dot(p.astype(bf16), vh,
                          preferred_element_type=f32)                 # (T, dk)
            ctx_scr[pl.ds(0, T), pl.ds(h * dk, dk)] = ctx.astype(bf16)

        # single full-contraction output projection
        attn = jnp.dot(ctx_scr[pl.ds(0, T), :], wo_ref[...],
                       preferred_element_type=f32)                    # (T, D)
        x1 = x + attn + bo_ref[...]                                   # (T, D) f32
        # TODO(synk): x1 is staged through VMEM only for the strided residual
        #             reload below (strided slicing of live values is not
        #             guaranteed to lower); cost is small vs. the matmuls.
        x1_scr[pl.ds(0, T), :] = x1

        # ---------- sublayer[1]: MaxPool1d(1,stride)(x1) + FFN(LN(x1)) ----------
        y2 = layer_norm(x1, ln2_a_ref, ln2_b_ref)
        h1 = jnp.maximum(
            jnp.dot(y2.astype(bf16), w1_ref[...], preferred_element_type=f32)
            + b1_ref[...], 0.0)                                       # (T, DFF) f32

        # zero-padded, 8-row-aligned slab: rows [0,8) = left pad (zeros),
        # rows [8, 8+T) = h1, rows [8+T, HS) = right pad (zeros).
        # (pads re-written every step: safe under megacore "parallel" splits)
        h_scr[pl.ds(0, 8), :] = jnp.zeros((8, DFF), f32)
        h_scr[pl.ds(8 + T, pad_tail), :] = jnp.zeros((pad_tail, DFF), f32)
        h_scr[pl.ds(8, T), :] = h1
        # TODO(synk): a bf16 slab would halve this scratch, but strided sublane
        #             loads of packed dtypes are not guaranteed to lower; keep f32.

        # kernel-3 / stride-s conv evaluated only at the strided output rows:
        # out[t] = sum_kk h1[t*s + kk - 1] @ w2[kk]   (zero padded)
        left = h_scr[pl.ds(7, T_out, stride=stride), :].astype(bf16)
        cent = h_scr[pl.ds(8, T_out, stride=stride), :].astype(bf16)
        right = h_scr[pl.ds(9, T_out, stride=stride), :].astype(bf16)
        acc = (jnp.dot(left, w2_ref[0], preferred_element_type=f32)
               + jnp.dot(cent, w2_ref[1], preferred_element_type=f32)
               + jnp.dot(right, w2_ref[2], preferred_element_type=f32)
               + b2_ref[...])                                         # (T_out, D)

        # MaxPool1d(kernel=1, stride) residual == strided row select of x1
        res = x1_scr[pl.ds(0, T_out, stride=stride), :]               # (T_out, D)
        out_ref[0] = (res + acc).astype(out_ref.dtype)

    return kernel


def encoder_layer_forward(x, mask, params, *, heads, stride, eps=1e-6):
    B, T, D = x.shape
    H = heads
    dk = D // H
    DFF = params["w1"].shape[1]
    T_out = (T - 1) // stride + 1
    T8 = ((T + 7) // 8) * 8
    HS = ((T + 16) // 8) * 8          # >= T + 9, multiple of 8
    f32, bf16 = jnp.float32, jnp.bfloat16

    # Host-side, once: per-head QKV weights concatenated to a (H, D, 3*dk)
    # tile so each head needs a single projection matmul.
    wq_h = params["wq"].reshape(D, H, dk).transpose(1, 0, 2)              # (H,D,dk)
    wk_h = params["wk"].reshape(D, H, dk).transpose(1, 0, 2)
    wv_h = params["wv"].reshape(D, H, dk).transpose(1, 0, 2)
    wqkv_r = jnp.concatenate([wq_h, wk_h, wv_h], axis=-1).astype(bf16)    # (H,D,3dk)
    bqkv_r = jnp.concatenate([params["bq"].reshape(H, 1, dk),
                              params["bk"].reshape(H, 1, dk),
                              params["bv"].reshape(H, 1, dk)],
                             axis=-1).astype(f32)                         # (H,1,3dk)
    wo = params["wo"].astype(bf16)                                        # (D, D)
    bo = params["bo"].astype(f32)
    ln1_a, ln1_b = params["ln1_a"].astype(f32), params["ln1_b"].astype(f32)
    ln2_a, ln2_b = params["ln2_a"].astype(f32), params["ln2_b"].astype(f32)
    w1 = params["w1"].astype(bf16)
    b1 = params["b1"].astype(f32)
    w2 = params["w2"].astype(bf16)
    b2 = params["b2"].astype(f32)

    # hoist the mask compare: additive 0 / -1e9 mask, computed once, bf16 to
    # halve its HBM DMA / double-buffered VMEM footprint.
    addmask = jnp.where(mask == 0, -1e9, 0.0).astype(bf16)                # (Bm,T,T)
    mb = addmask.shape[0]

    kernel = _make_kernel(T, T_out, D, H, DFF, stride, eps, HS)

    inputs = [x.astype(f32), addmask,
              ln1_a, ln1_b,
              wqkv_r, bqkv_r, wo, bo,
              ln2_a, ln2_b,
              w1, b1, w2, b2]

    def p_spec(arr):
        nd = arr.ndim
        return pl.BlockSpec(arr.shape, lambda b, _n=nd: (0,) * _n)

    mask_map = (lambda b: (0, 0, 0)) if mb == 1 else (lambda b: (b, 0, 0))
    in_specs = [pl.BlockSpec((1, T, D), lambda b: (b, 0, 0)),
                pl.BlockSpec((1, T, T), mask_map)]
    in_specs += [p_spec(a) for a in inputs[2:]]

    # VMEM budget derived from the actual footprint (double-buffered blocks +
    # scratch + margin), clamped to the chip's physical VMEM.
    blk_bytes = (x.size // B) * 4
    blk_bytes += (addmask.size // mb) * addmask.dtype.itemsize
    blk_bytes += sum(int(a.size) * a.dtype.itemsize for a in inputs[2:])
    out_bytes = T_out * D * x.dtype.itemsize
    scratch_bytes = T8 * D * 2 + T8 * D * 4 + HS * DFF * 4
    need = 2 * (blk_bytes + out_bytes) + scratch_bytes + (4 << 20)
    try:
        phys = int(pltpu.get_tpu_info().vmem_capacity_bytes)
    except Exception:
        phys = 64 << 20
    vmem_limit = int(min(phys, max(need, 32 << 20)))

    # TODO(synk): for production, D a multiple of 128 makes the output stores
    #             lane-dense; D=32 here forces masked partial stores.
    return pl.pallas_call(
        kernel,
        out_shape=jax.ShapeDtypeStruct((B, T_out, D), x.dtype),
        grid=(B,),
        in_specs=in_specs,
        out_specs=pl.BlockSpec((1, T_out, D), lambda b: (b, 0, 0)),
        scratch_shapes=[pltpu.VMEM((T8, D), bf16),   # per-head ctx columns (no lane concat)
                        pltpu.VMEM((T8, D), f32),    # x1 (strided residual source)
                        pltpu.VMEM((HS, DFF), f32)], # zero-padded h1 slab
        compiler_params=pltpu.CompilerParams(
            dimension_semantics=("parallel",),
            vmem_limit_bytes=vmem_limit),
    )(*inputs)


def reference(x, mask, params, heads, stride, eps=1e-6):
    """Plain-JAX reference with the same bf16-operand / f32-accumulate policy."""
    B, T, D = x.shape
    H = heads
    dk = D // H
    f32, bf16 = jnp.float32, jnp.bfloat16

    def ln(v, a, b):
        mean = v.mean(-1, keepdims=True)
        std = jnp.sqrt(((v - mean) ** 2).sum(-1, keepdims=True) / (D - 1))
        return a[0] * (v - mean) / (std + eps) + b[0]

    addmask = jnp.where(mask == 0, -1e9, 0.0).astype(f32)                  # (1,T,T)

    y = ln(x, params["ln1_a"], params["ln1_b"])
    y16 = y.astype(bf16)

    def proj(w, b):
        return jnp.dot(y16, w.astype(bf16), preferred_element_type=f32) + b[0]

    q = proj(params["wq"], params["bq"]) * (1.0 / math.sqrt(dk))  # scale folded into q
    k = proj(params["wk"], params["bk"])
    v = proj(params["wv"], params["bv"])

    def split(t):
        return t.reshape(B, T, H, dk).transpose(0, 2, 1, 3)

    qh, kh, vh = split(q), split(k), split(v)
    s = jnp.einsum("bhqd,bhkd->bhqk", qh.astype(bf16), kh.astype(bf16),
                   preferred_element_type=f32)
    s = s + addmask[:, None, :, :]
    p = jax.nn.softmax(s, axis=-1)
    ctx = jnp.einsum("bhqk,bhkd->bhqd", p.astype(bf16), vh.astype(bf16),
                     preferred_element_type=f32)
    ctx = ctx.transpose(0, 2, 1, 3).reshape(B, T, D)
    attn = jnp.dot(ctx.astype(bf16), params["wo"].astype(bf16),
                   preferred_element_type=f32) + params["bo"][0]
    x1 = x + attn

    y2 = ln(x1, params["ln2_a"], params["ln2_b"])
    h1 = jax.nn.relu(jnp.dot(y2.astype(bf16), params["w1"].astype(bf16),
                             preferred_element_type=f32) + params["b1"][0])
    h1 = h1.astype(bf16)
    h_pad = jnp.pad(h1, ((0, 0), (1, 1), (0, 0)))
    acc = jnp.zeros((B, T, D), f32)
    for kk in range(3):
        acc = acc + jnp.dot(h_pad[:, kk:kk + T, :], params["w2"][kk].astype(bf16),
                            preferred_element_type=f32)
    acc = acc + params["b2"][0]
    T_out = (T - 1) // stride + 1
    idx = jnp.arange(T_out) * stride
    return x1[:, idx, :] + acc[:, idx, :]


if __name__ == "__main__":
    B, T, D, H, DFF = 2, 8, 32, 4, 64
    stride_num = [2]
    i = 0

    key = jax.random.PRNGKey(0)
    keys = jax.random.split(key, 12)

    def nrm(k, shape, scale=0.05):
        return scale * jax.random.normal(k, shape, jnp.float32)

    params = {
        "ln1_a": jnp.ones((1, D), jnp.float32),
        "ln1_b": jnp.zeros((1, D), jnp.float32),
        "ln2_a": jnp.ones((1, D), jnp.float32),
        "ln2_b": jnp.zeros((1, D), jnp.float32),
        "wq": nrm(keys[0], (D, D)), "bq": nrm(keys[1], (1, D)),
        "wk": nrm(keys[2], (D, D)), "bk": nrm(keys[3], (1, D)),
        "wv": nrm(keys[4], (D, D)), "bv": nrm(keys[5], (1, D)),
        "wo": nrm(keys[6], (D, D)), "bo": nrm(keys[7], (1, D)),
        "w1": nrm(keys[8], (D, DFF)), "b1": nrm(keys[9], (1, DFF)),
        "w2": nrm(keys[10], (3, DFF, D)), "b2": nrm(keys[11], (1, D)),
    }

    kx = jax.random.fold_in(key, 123)
    x = jax.random.normal(kx, (B, T, D), jnp.float32)
    mask = jnp.ones((1, T, T), jnp.float32)   # attention mask (all valid)

    out = encoder_layer_forward(x, mask, params, heads=H, stride=stride_num[i])
    out = jax.block_until_ready(out)

    ref = reference(x, mask, params, heads=H, stride=stride_num[i])
    T_out = (T - 1) // stride_num[i] + 1
    assert out.shape == (B, T_out, D), out.shape
    max_err = float(jnp.max(jnp.abs(out - ref)))
    assert jnp.allclose(out, ref, rtol=2e-3, atol=2e-3), max_err
    print("KERNEL_OK")
</pallas_src>

<mosaic_0001>
module attributes {stable_mosaic.version = 11 : i64} {
  func.func @kernel(%arg0: i32, %arg1: memref<1x8x32xf32, #tpu.memory_space<vmem>>, %arg2: memref<1x8x8xbf16, #tpu.memory_space<vmem>>, %arg3: memref<1x32xf32, #tpu.memory_space<vmem>>, %arg4: memref<1x32xf32, #tpu.memory_space<vmem>>, %arg5: memref<4x32x24xbf16, #tpu.memory_space<vmem>>, %arg6: memref<4x1x24xf32, #tpu.memory_space<vmem>>, %arg7: memref<32x32xbf16, #tpu.memory_space<vmem>>, %arg8: memref<1x32xf32, #tpu.memory_space<vmem>>, %arg9: memref<1x32xf32, #tpu.memory_space<vmem>>, %arg10: memref<1x32xf32, #tpu.memory_space<vmem>>, %arg11: memref<32x64xbf16, #tpu.memory_space<vmem>>, %arg12: memref<1x64xf32, #tpu.memory_space<vmem>>, %arg13: memref<3x64x32xbf16, #tpu.memory_space<vmem>>, %arg14: memref<1x32xf32, #tpu.memory_space<vmem>>, %arg15: memref<1x4x32xf32, #tpu.memory_space<vmem>>, %arg16: memref<8x32xbf16, #tpu.memory_space<vmem>>, %arg17: memref<8x32xf32, #tpu.memory_space<vmem>>, %arg18: memref<24x64xf32, #tpu.memory_space<vmem>>) attributes {dimension_semantics = [#tpu.dimension_semantics<parallel>], iteration_bounds = array<i64: 2>, scalar_prefetch = 0 : i64, scratch_operands = 3 : i64, tpu.core_type = #tpu.core_type<tc>, window_params = [{transform_indices = @transform_0, window_bounds = array<i64: 1, 8, 32>}, {pipeline_mode = #tpu.pipeline_mode<synchronous>, transform_indices = @transform_1, window_bounds = array<i64: 1, 8, 8>}, {pipeline_mode = #tpu.pipeline_mode<synchronous>, transform_indices = @transform_2, window_bounds = array<i64: 1, 32>}, {pipeline_mode = #tpu.pipeline_mode<synchronous>, transform_indices = @transform_3, window_bounds = array<i64: 1, 32>}, {pipeline_mode = #tpu.pipeline_mode<synchronous>, transform_indices = @transform_4, window_bounds = array<i64: 4, 32, 24>}, {pipeline_mode = #tpu.pipeline_mode<synchronous>, transform_indices = @transform_5, window_bounds = array<i64: 4, 1, 24>}, {pipeline_mode = #tpu.pipeline_mode<synchronous>, transform_indices = @transform_6, window_bounds = array<i64: 32, 32>}, {pipeline_mode = #tpu.pipeline_mode<synchronous>, transform_indices = @transform_7, window_bounds = array<i64: 1, 32>}, {pipeline_mode = #tpu.pipeline_mode<synchronous>, transform_indices = @transform_8, window_bounds = array<i64: 1, 32>}, {pipeline_mode = #tpu.pipeline_mode<synchronous>, transform_indices = @transform_9, window_bounds = array<i64: 1, 32>}, {pipeline_mode = #tpu.pipeline_mode<synchronous>, transform_indices = @transform_10, window_bounds = array<i64: 32, 64>}, {pipeline_mode = #tpu.pipeline_mode<synchronous>, transform_indices = @transform_11, window_bounds = array<i64: 1, 64>}, {pipeline_mode = #tpu.pipeline_mode<synchronous>, transform_indices = @transform_12, window_bounds = array<i64: 3, 64, 32>}, {pipeline_mode = #tpu.pipeline_mode<synchronous>, transform_indices = @transform_13, window_bounds = array<i64: 1, 32>}, {transform_indices = @transform_14, window_bounds = array<i64: 1, 4, 32>}]} {
    %c0 = arith.constant 0 : index
    %c0_0 = arith.constant 0 : index
    %c0_1 = arith.constant 0 : index
    %0 = vector.load %arg1[%c0, %c0_0, %c0_1] : memref<1x8x32xf32, #tpu.memory_space<vmem>>, vector<1x8x32xf32>
    %1 = vector.shape_cast %0 : vector<1x8x32xf32> to vector<8x32xf32>
    %c0_2 = arith.constant 0 : index
    %c0_3 = arith.constant 0 : index
    %c0_4 = arith.constant 0 : index
    %2 = vector.load %arg2[%c0_2, %c0_3, %c0_4] : memref<1x8x8xbf16, #tpu.memory_space<vmem>>, vector<1x8x8xbf16>
    %3 = vector.shape_cast %2 : vector<1x8x8xbf16> to vector<8x8xbf16>
    %4 = arith.extf %3 : vector<8x8xbf16> to vector<8x8xf32>
    %cst = arith.constant dense<0.000000e+00> : vector<8xf32>
    %5 = vector.multi_reduction <add>, %1, %cst [1] : vector<8x32xf32> to vector<8xf32>
    %6 = vector.shape_cast %5 : vector<8xf32> to vector<8x1xf32>
    %cst_5 = arith.constant 3.200000e+01 : f32
    %7 = vector.broadcast %cst_5 : f32 to vector<8x1xf32>
    %8 = arith.divf %6, %7 : vector<8x1xf32>
    %9 = vector.broadcast %8 : vector<8x1xf32> to vector<8x32xf32>
    %10 = arith.subf %1, %9 : vector<8x32xf32>
    %11 = arith.mulf %10, %10 : vector<8x32xf32>
    %cst_6 = arith.constant dense<0.000000e+00> : vector<8xf32>
    %12 = vector.multi_reduction <add>, %11, %cst_6 [1] : vector<8x32xf32> to vector<8xf32>
    %13 = vector.shape_cast %12 : vector<8xf32> to vector<8x1xf32>
    %cst_7 = arith.constant 0.0322580636 : f32
    %14 = vector.broadcast %cst_7 : f32 to vector<8x1xf32>
    %15 = arith.mulf %13, %14 : vector<8x1xf32>
    %16 = math.sqrt %15 : vector<8x1xf32>
    %c0_8 = arith.constant 0 : index
    %c0_9 = arith.constant 0 : index
    %17 = vector.load %arg3[%c0_8, %c0_9] : memref<1x32xf32, #tpu.memory_space<vmem>>, vector<1x32xf32>
    %18 = vector.broadcast %8 : vector<8x1xf32> to vector<8x32xf32>
    %19 = arith.subf %1, %18 : vector<8x32xf32>
    %20 = vector.broadcast %17 : vector<1x32xf32> to vector<8x32xf32>
    %21 = arith.mulf %20, %19 : vector<8x32xf32>
    %cst_10 = arith.constant 9.99999997E-7 : f32
    %22 = vector.broadcast %cst_10 : f32 to vector<8x1xf32>
    %23 = arith.addf %16, %22 : vector<8x1xf32>
    %24 = vector.broadcast %23 : vector<8x1xf32> to vector<8x32xf32>
    %25 = arith.divf %21, %24 : vector<8x32xf32>
    %c0_11 = arith.constant 0 : index
    %c0_12 = arith.constant 0 : index
    %26 = vector.load %arg4[%c0_11, %c0_12] : memref<1x32xf32, #tpu.memory_space<vmem>>, vector<1x32xf32>
    %27 = vector.broadcast %26 : vector<1x32xf32> to vector<8x32xf32>
    %28 = arith.addf %25, %27 : vector<8x32xf32>
    %29 = arith.truncf %28 : vector<8x32xf32> to vector<8x32xbf16>
    %c0_13 = arith.constant 0 : index
    %c0_14 = arith.constant 0 : index
    %c0_15 = arith.constant 0 : index
    %30 = vector.load %arg5[%c0_13, %c0_14, %c0_15] : memref<4x32x24xbf16, #tpu.memory_space<vmem>>, vector<1x32x24xbf16>
    %31 = vector.shape_cast %30 : vector<1x32x24xbf16> to vector<32x24xbf16>
    %cst_16 = arith.constant dense<0.000000e+00> : vector<8x24xf32>
    %32 = tpu.matmul %29, %31, %cst_16 {dimension_numbers = #tpu.dot_dimension_numbers<[1], [0], [0], [1], [0, 0, 1, 1], [], []>} : vector<8x32xbf16>, vector<32x24xbf16>, vector<8x24xf32> -> vector<8x24xf32>
    %c0_17 = arith.constant 0 : index
    %c0_18 = arith.constant 0 : index
    %c0_19 = arith.constant 0 : index
    %33 = vector.load %arg6[%c0_17, %c0_18, %c0_19] : memref<4x1x24xf32, #tpu.memory_space<vmem>>, vector<1x1x24xf32>
    %34 = vector.shape_cast %33 : vector<1x1x24xf32> to vector<1x24xf32>
    %35 = vector.broadcast %34 : vector<1x24xf32> to vector<8x24xf32>
    %36 = arith.addf %32, %35 : vector<8x24xf32>
    %37 = vector.extract_strided_slice %36 {offsets = [0, 0], sizes = [8, 8], strides = [1, 1]} : vector<8x24xf32> to vector<8x8xf32>
    %cst_20 = arith.constant 0.353553385 : f32
    %38 = vector.broadcast %cst_20 : f32 to vector<8x8xf32>
    %39 = arith.mulf %37, %38 : vector<8x8xf32>
    %40 = arith.truncf %39 : vector<8x8xf32> to vector<8x8xbf16>
    %41 = vector.extract_strided_slice %36 {offsets = [0, 8], sizes = [8, 8], strides = [1, 1]} : vector<8x24xf32> to vector<8x8xf32>
    %42 = arith.truncf %41 : vector<8x8xf32> to vector<8x8xbf16>
    %43 = vector.extract_strided_slice %36 {offsets = [0, 16], sizes = [8, 8], strides = [1, 1]} : vector<8x24xf32> to vector<8x8xf32>
    %44 = arith.truncf %43 : vector<8x8xf32> to vector<8x8xbf16>
    %cst_21 = arith.constant dense<0.000000e+00> : vector<8x8xf32>
    %45 = tpu.matmul %40, %42, %cst_21 {dimension_numbers = #tpu.dot_dimension_numbers<[1], [1], [0], [0], [0, 0, 1, 0], [], []>} : vector<8x8xbf16>, vector<8x8xbf16>, vector<8x8xf32> -> vector<8x8xf32>
    %46 = arith.addf %45, %4 : vector<8x8xf32>
    %cst_22 = arith.constant dense<0xFF800000> : vector<8xf32>
    %47 = vector.multi_reduction <maximumf>, %46, %cst_22 [1] : vector<8x8xf32> to vector<8xf32>
    %48 = vector.shape_cast %47 : vector<8xf32> to vector<8x1xf32>
    %49 = vector.broadcast %48 : vector<8x1xf32> to vector<8x8xf32>
    %50 = arith.subf %46, %49 : vector<8x8xf32>
    %51 = math.exp %50 : vector<8x8xf32>
    %cst_23 = arith.constant dense<0.000000e+00> : vector<8xf32>
    %52 = vector.multi_reduction <add>, %51, %cst_23 [1] : vector<8x8xf32> to vector<8xf32>
    %53 = vector.shape_cast %52 : vector<8xf32> to vector<8x1xf32>
    %54 = tpu.reciprocal %53 {approx = true} : vector<8x1xf32> -> vector<8x1xf32>
    %55 = vector.broadcast %54 : vector<8x1xf32> to vector<8x8xf32>
    %56 = arith.mulf %51, %55 : vector<8x8xf32>
    %57 = arith.truncf %56 : vector<8x8xf32> to vector<8x8xbf16>
    %cst_24 = arith.constant dense<0.000000e+00> : vector<8x8xf32>
    %58 = tpu.matmul %57, %44, %cst_24 {dimension_numbers = #tpu.dot_dimension_numbers<[1], [0], [0], [1], [0, 0, 1, 1], [], []>} : vector<8x8xbf16>, vector<8x8xbf16>, vector<8x8xf32> -> vector<8x8xf32>
    %59 = arith.truncf %58 : vector<8x8xf32> to vector<8x8xbf16>
    %c0_25 = arith.constant 0 : index
    %c0_26 = arith.constant 0 : index
    %60 = vector.load %arg16[%c0_25, %c0_26] : memref<8x32xbf16, #tpu.memory_space<vmem>>, vector<8x8xbf16>
    tpu.vector_store %arg16[%c0_25, %c0_26], %59 {strides = array<i32>} : memref<8x32xbf16, #tpu.memory_space<vmem>>, vector<8x8xbf16>,
    %c1 = arith.constant 1 : index
    %c0_27 = arith.constant 0 : index
    %c0_28 = arith.constant 0 : index
    %61 = vector.load %arg5[%c1, %c0_27, %c0_28] : memref<4x32x24xbf16, #tpu.memory_space<vmem>>, vector<1x32x24xbf16>
    %62 = vector.shape_cast %61 : vector<1x32x24xbf16> to vector<32x24xbf16>
    %cst_29 = arith.constant dense<0.000000e+00> : vector<8x24xf32>
    %63 = tpu.matmul %29, %62, %cst_29 {dimension_numbers = #tpu.dot_dimension_numbers<[1], [0], [0], [1], [0, 0, 1, 1], [], []>} : vector<8x32xbf16>, vector<32x24xbf16>, vector<8x24xf32> -> vector<8x24xf32>
    %c1_30 = arith.constant 1 : index
    %c0_31 = arith.constant 0 : index
    %c0_32 = arith.constant 0 : index
    %64 = vector.load %arg6[%c1_30, %c0_31, %c0_32] : memref<4x1x24xf32, #tpu.memory_space<vmem>>, vector<1x1x24xf32>
    %65 = vector.shape_cast %64 : vector<1x1x24xf32> to vector<1x24xf32>
    %66 = vector.broadcast %65 : vector<1x24xf32> to vector<8x24xf32>
    %67 = arith.addf %63, %66 : vector<8x24xf32>
    %68 = vector.extract_strided_slice %67 {offsets = [0, 0], sizes = [8, 8], strides = [1, 1]} : vector<8x24xf32> to vector<8x8xf32>
    %cst_33 = arith.constant 0.353553385 : f32
    %69 = vector.broadcast %cst_33 : f32 to vector<8x8xf32>
    %70 = arith.mulf %68, %69 : vector<8x8xf32>
    %71 = arith.truncf %70 : vector<8x8xf32> to vector<8x8xbf16>
    %72 = vector.extract_strided_slice %67 {offsets = [0, 8], sizes = [8, 8], strides = [1, 1]} : vector<8x24xf32> to vector<8x8xf32>
    %73 = arith.truncf %72 : vector<8x8xf32> to vector<8x8xbf16>
    %74 = vector.extract_strided_slice %67 {offsets = [0, 16], sizes = [8, 8], strides = [1, 1]} : vector<8x24xf32> to vector<8x8xf32>
    %75 = arith.truncf %74 : vector<8x8xf32> to vector<8x8xbf16>
    %cst_34 = arith.constant dense<0.000000e+00> : vector<8x8xf32>
    %76 = tpu.matmul %71, %73, %cst_34 {dimension_numbers = #tpu.dot_dimension_numbers<[1], [1], [0], [0], [0, 0, 1, 0], [], []>} : vector<8x8xbf16>, vector<8x8xbf16>, vector<8x8xf32> -> vector<8x8xf32>
    %77 = arith.addf %76, %4 : vector<8x8xf32>
    %cst_35 = arith.constant dense<0xFF800000> : vector<8xf32>
    %78 = vector.multi_reduction <maximumf>, %77, %cst_35 [1] : vector<8x8xf32> to vector<8xf32>
    %79 = vector.shape_cast %78 : vector<8xf32> to vector<8x1xf32>
    %80 = vector.broadcast %79 : vector<8x1xf32> to vector<8x8xf32>
    %81 = arith.subf %77, %80 : vector<8x8xf32>
    %82 = math.exp %81 : vector<8x8xf32>
    %cst_36 = arith.constant dense<0.000000e+00> : vector<8xf32>
    %83 = vector.multi_reduction <add>, %82, %cst_36 [1] : vector<8x8xf32> to vector<8xf32>
    %84 = vector.shape_cast %83 : vector<8xf32> to vector<8x1xf32>
    %85 = tpu.reciprocal %84 {approx = true} : vector<8x1xf32> -> vector<8x1xf32>
    %86 = vector.broadcast %85 : vector<8x1xf32> to vector<8x8xf32>
    %87 = arith.mulf %82, %86 : vector<8x8xf32>
    %88 = arith.truncf %87 : vector<8x8xf32> to vector<8x8xbf16>
    %cst_37 = arith.constant dense<0.000000e+00> : vector<8x8xf32>
    %89 = tpu.matmul %88, %75, %cst_37 {dimension_numbers = #tpu.dot_dimension_numbers<[1], [0], [0], [1], [0, 0, 1, 1], [], []>} : vector<8x8xbf16>, vector<8x8xbf16>, vector<8x8xf32> -> vector<8x8xf32>
    %90 = arith.truncf %89 : vector<8x8xf32> to vector<8x8xbf16>
    %c0_38 = arith.constant 0 : index
    %c8 = arith.constant 8 : index
    %91 = vector.load %arg16[%c0_38, %c8] : memref<8x32xbf16, #tpu.memory_space<vmem>>, vector<8x8xbf16>
    tpu.vector_store %arg16[%c0_38, %c8], %90 {strides = array<i32>} : memref<8x32xbf16, #tpu.memory_space<vmem>>, vector<8x8xbf16>,
    %c2 = arith.constant 2 : index
    %c0_39 = arith.constant 0 : index
    %c0_40 = arith.constant 0 : index
    %92 = vector.load %arg5[%c2, %c0_39, %c0_40] : memref<4x32x24xbf16, #tpu.memory_space<vmem>>, vector<1x32x24xbf16>
    %93 = vector.shape_cast %92 : vector<1x32x24xbf16> to vector<32x24xbf16>
    %cst_41 = arith.constant dense<0.000000e+00> : vector<8x24xf32>
    %94 = tpu.matmul %29, %93, %cst_41 {dimension_numbers = #tpu.dot_dimension_numbers<[1], [0], [0], [1], [0, 0, 1, 1], [], []>} : vector<8x32xbf16>, vector<32x24xbf16>, vector<8x24xf32> -> vector<8x24xf32>
    %c2_42 = arith.constant 2 : index
    %c0_43 = arith.constant 0 : index
    %c0_44 = arith.constant 0 : index
    %95 = vector.load %arg6[%c2_42, %c0_43, %c0_44] : memref<4x1x24xf32, #tpu.memory_space<vmem>>, vector<1x1x24xf32>
    %96 = vector.shape_cast %95 : vector<1x1x24xf32> to vector<1x24xf32>
    %97 = vector.broadcast %96 : vector<1x24xf32> to vector<8x24xf32>
    %98 = arith.addf %94, %97 : vector<8x24xf32>
    %99 = vector.extract_strided_slice %98 {offsets = [0, 0], sizes = [8, 8], strides = [1, 1]} : vector<8x24xf32> to vector<8x8xf32>
    %cst_45 = arith.constant 0.353553385 : f32
    %100 = vector.broadcast %cst_45 : f32 to vector<8x8xf32>
    %101 = arith.mulf %99, %100 : vector<8x8xf32>
    %102 = arith.truncf %101 : vector<8x8xf32> to vector<8x8xbf16>
    %103 = vector.extract_strided_slice %98 {offsets = [0, 8], sizes = [8, 8], strides = [1, 1]} : vector<8x24xf32> to vector<8x8xf32>
    %104 = arith.truncf %103 : vector<8x8xf32> to vector<8x8xbf16>
    %105 = vector.extract_strided_slice %98 {offsets = [0, 16], sizes = [8, 8], strides = [1, 1]} : vector<8x24xf32> to vector<8x8xf32>
    %106 = arith.truncf %105 : vector<8x8xf32> to vector<8x8xbf16>
    %cst_46 = arith.constant dense<0.000000e+00> : vector<8x8xf32>
    %107 = tpu.matmul %102, %104, %cst_46 {dimension_numbers = #tpu.dot_dimension_numbers<[1], [1], [0], [0], [0, 0, 1, 0], [], []>} : vector<8x8xbf16>, vector<8x8xbf16>, vector<8x8xf32> -> vector<8x8xf32>
    %108 = arith.addf %107, %4 : vector<8x8xf32>
    %cst_47 = arith.constant dense<0xFF800000> : vector<8xf32>
    %109 = vector.multi_reduction <maximumf>, %108, %cst_47 [1] : vector<8x8xf32> to vector<8xf32>
    %110 = vector.shape_cast %109 : vector<8xf32> to vector<8x1xf32>
    %111 = vector.broadcast %110 : vector<8x1xf32> to vector<8x8xf32>
    %112 = arith.subf %108, %111 : vector<8x8xf32>
    %113 = math.exp %112 : vector<8x8xf32>
    %cst_48 = arith.constant dense<0.000000e+00> : vector<8xf32>
    %114 = vector.multi_reduction <add>, %113, %cst_48 [1] : vector<8x8xf32> to vector<8xf32>
    %115 = vector.shape_cast %114 : vector<8xf32> to vector<8x1xf32>
    %116 = tpu.reciprocal %115 {approx = true} : vector<8x1xf32> -> vector<8x1xf32>
    %117 = vector.broadcast %116 : vector<8x1xf32> to vector<8x8xf32>
    %118 = arith.mulf %113, %117 : vector<8x8xf32>
    %119 = arith.truncf %118 : vector<8x8xf32> to vector<8x8xbf16>
    %cst_49 = arith.constant dense<0.000000e+00> : vector<8x8xf32>
    %120 = tpu.matmul %119, %106, %cst_49 {dimension_numbers = #tpu.dot_dimension_numbers<[1], [0], [0], [1], [0, 0, 1, 1], [], []>} : vector<8x8xbf16>, vector<8x8xbf16>, vector<8x8xf32> -> vector<8x8xf32>
    %121 = arith.truncf %120 : vector<8x8xf32> to vector<8x8xbf16>
    %c0_50 = arith.constant 0 : index
    %c16 = arith.constant 16 : index
    %122 = vector.load %arg16[%c0_50, %c16] : memref<8x32xbf16, #tpu.memory_space<vmem>>, vector<8x8xbf16>
    tpu.vector_store %arg16[%c0_50, %c16], %121 {strides = array<i32>} : memref<8x32xbf16, #tpu.memory_space<vmem>>, vector<8x8xbf16>,
    %c3 = arith.constant 3 : index
    %c0_51 = arith.constant 0 : index
    %c0_52 = arith.constant 0 : index
    %123 = vector.load %arg5[%c3, %c0_51, %c0_52] : memref<4x32x24xbf16, #tpu.memory_space<vmem>>, vector<1x32x24xbf16>
    %124 = vector.shape_cast %123 : vector<1x32x24xbf16> to vector<32x24xbf16>
    %cst_53 = arith.constant dense<0.000000e+00> : vector<8x24xf32>
    %125 = tpu.matmul %29, %124, %cst_53 {dimension_numbers = #tpu.dot_dimension_numbers<[1], [0], [0], [1], [0, 0, 1, 1], [], []>} : vector<8x32xbf16>, vector<32x24xbf16>, vector<8x24xf32> -> vector<8x24xf32>
    %c3_54 = arith.constant 3 : index
    %c0_55 = arith.constant 0 : index
    %c0_56 = arith.constant 0 : index
    %126 = vector.load %arg6[%c3_54, %c0_55, %c0_56] : memref<4x1x24xf32, #tpu.memory_space<vmem>>, vector<1x1x24xf32>
    %127 = vector.shape_cast %126 : vector<1x1x24xf32> to vector<1x24xf32>
    %128 = vector.broadcast %127 : vector<1x24xf32> to vector<8x24xf32>
    %129 = arith.addf %125, %128 : vector<8x24xf32>
    %130 = vector.extract_strided_slice %129 {offsets = [0, 0], sizes = [8, 8], strides = [1, 1]} : vector<8x24xf32> to vector<8x8xf32>
    %cst_57 = arith.constant 0.353553385 : f32
    %131 = vector.broadcast %cst_57 : f32 to vector<8x8xf32>
    %132 = arith.mulf %130, %131 : vector<8x8xf32>
    %133 = arith.truncf %132 : vector<8x8xf32> to vector<8x8xbf16>
    %134 = vector.extract_strided_slice %129 {offsets = [0, 8], sizes = [8, 8], strides = [1, 1]} : vector<8x24xf32> to vector<8x8xf32>
    %135 = arith.truncf %134 : vector<8x8xf32> to vector<8x8xbf16>
    %136 = vector.extract_strided_slice %129 {offsets = [0, 16], sizes = [8, 8], strides = [1, 1]} : vector<8x24xf32> to vector<8x8xf32>
    %137 = arith.truncf %136 : vector<8x8xf32> to vector<8x8xbf16>
    %cst_58 = arith.constant dense<0.000000e+00> : vector<8x8xf32>
    %138 = tpu.matmul %133, %135, %cst_58 {dimension_numbers = #tpu.dot_dimension_numbers<[1], [1], [0], [0], [0, 0, 1, 0], [], []>} : vector<8x8xbf16>, vector<8x8xbf16>, vector<8x8xf32> -> vector<8x8xf32>
    %139 = arith.addf %138, %4 : vector<8x8xf32>
    %cst_59 = arith.constant dense<0xFF800000> : vector<8xf32>
    %140 = vector.multi_reduction <maximumf>, %139, %cst_59 [1] : vector<8x8xf32> to vector<8xf32>
    %141 = vector.shape_cast %140 : vector<8xf32> to vector<8x1xf32>
    %142 = vector.broadcast %141 : vector<8x1xf32> to vector<8x8xf32>
    %143 = arith.subf %139, %142 : vector<8x8xf32>
    %144 = math.exp %143 : vector<8x8xf32>
    %cst_60 = arith.constant dense<0.000000e+00> : vector<8xf32>
    %145 = vector.multi_reduction <add>, %144, %cst_60 [1] : vector<8x8xf32> to vector<8xf32>
    %146 = vector.shape_cast %145 : vector<8xf32> to vector<8x1xf32>
    %147 = tpu.reciprocal %146 {approx = true} : vector<8x1xf32> -> vector<8x1xf32>
    %148 = vector.broadcast %147 : vector<8x1xf32> to vector<8x8xf32>
    %149 = arith.mulf %144, %148 : vector<8x8xf32>
    %150 = arith.truncf %149 : vector<8x8xf32> to vector<8x8xbf16>
    %cst_61 = arith.constant dense<0.000000e+00> : vector<8x8xf32>
    %151 = tpu.matmul %150, %137, %cst_61 {dimension_numbers = #tpu.dot_dimension_numbers<[1], [0], [0], [1], [0, 0, 1, 1], [], []>} : vector<8x8xbf16>, vector<8x8xbf16>, vector<8x8xf32> -> vector<8x8xf32>
    %152 = arith.truncf %151 : vector<8x8xf32> to vector<8x8xbf16>
    %c0_62 = arith.constant 0 : index
    %c24 = arith.constant 24 : index
    %153 = vector.load %arg16[%c0_62, %c24] : memref<8x32xbf16, #tpu.memory_space<vmem>>, vector<8x8xbf16>
    tpu.vector_store %arg16[%c0_62, %c24], %152 {strides = array<i32>} : memref<8x32xbf16, #tpu.memory_space<vmem>>, vector<8x8xbf16>,
    %c0_63 = arith.constant 0 : index
    %c0_64 = arith.constant 0 : index
    %154 = vector.load %arg16[%c0_63, %c0_64] : memref<8x32xbf16, #tpu.memory_space<vmem>>, vector<8x32xbf16>
    %c0_65 = arith.constant 0 : index
    %c0_66 = arith.constant 0 : index
    %155 = vector.load %arg7[%c0_65, %c0_66] : memref<32x32xbf16, #tpu.memory_space<vmem>>, vector<32x32xbf16>
    %cst_67 = arith.constant dense<0.000000e+00> : vector<8x32xf32>
    %156 = tpu.matmul %154, %155, %cst_67 {dimension_numbers = #tpu.dot_dimension_numbers<[1], [0], [0], [1], [0, 0, 1, 1], [], []>} : vector<8x32xbf16>, vector<32x32xbf16>, vector<8x32xf32> -> vector<8x32xf32>
    %157 = arith.addf %1, %156 : vector<8x32xf32>
    %c0_68 = arith.constant 0 : index
    %c0_69 = arith.constant 0 : index
    %158 = vector.load %arg8[%c0_68, %c0_69] : memref<1x32xf32, #tpu.memory_space<vmem>>, vector<1x32xf32>
    %159 = vector.broadcast %158 : vector<1x32xf32> to vector<8x32xf32>
    %160 = arith.addf %157, %159 : vector<8x32xf32>
    %c0_70 = arith.constant 0 : index
    %c0_71 = arith.constant 0 : index
    %161 = vector.load %arg17[%c0_70, %c0_71] : memref<8x32xf32, #tpu.memory_space<vmem>>, vector<8x32xf32>
    tpu.vector_store %arg17[%c0_70, %c0_71], %160 {strides = array<i32>} : memref<8x32xf32, #tpu.memory_space<vmem>>, vector<8x32xf32>,
    %cst_72 = arith.constant dense<0.000000e+00> : vector<8xf32>
    %162 = vector.multi_reduction <add>, %160, %cst_72 [1] : vector<8x32xf32> to vector<8xf32>
    %163 = vector.shape_cast %162 : vector<8xf32> to vector<8x1xf32>
    %cst_73 = arith.constant 3.200000e+01 : f32
    %164 = vector.broadcast %cst_73 : f32 to vector<8x1xf32>
    %165 = arith.divf %163, %164 : vector<8x1xf32>
    %166 = vector.broadcast %165 : vector<8x1xf32> to vector<8x32xf32>
    %167 = arith.subf %160, %166 : vector<8x32xf32>
    %168 = arith.mulf %167, %167 : vector<8x32xf32>
    %cst_74 = arith.constant dense<0.000000e+00> : vector<8xf32>
    %169 = vector.multi_reduction <add>, %168, %cst_74 [1] : vector<8x32xf32> to vector<8xf32>
    %170 = vector.shape_cast %169 : vector<8xf32> to vector<8x1xf32>
    %cst_75 = arith.constant 0.0322580636 : f32
    %171 = vector.broadcast %cst_75 : f32 to vector<8x1xf32>
    %172 = arith.mulf %170, %171 : vector<8x1xf32>
    %173 = math.sqrt %172 : vector<8x1xf32>
    %c0_76 = arith.constant 0 : index
    %c0_77 = arith.constant 0 : index
    %174 = vector.load %arg9[%c0_76, %c0_77] : memref<1x32xf32, #tpu.memory_space<vmem>>, vector<1x32xf32>
    %175 = vector.broadcast %165 : vector<8x1xf32> to vector<8x32xf32>
    %176 = arith.subf %160, %175 : vector<8x32xf32>
    %177 = vector.broadcast %174 : vector<1x32xf32> to vector<8x32xf32>
    %178 = arith.mulf %177, %176 : vector<8x32xf32>
    %cst_78 = arith.constant 9.99999997E-7 : f32
    %179 = vector.broadcast %cst_78 : f32 to vector<8x1xf32>
    %180 = arith.addf %173, %179 : vector<8x1xf32>
    %181 = vector.broadcast %180 : vector<8x1xf32> to vector<8x32xf32>
    %182 = arith.divf %178, %181 : vector<8x32xf32>
    %c0_79 = arith.constant 0 : index
    %c0_80 = arith.constant 0 : index
    %183 = vector.load %arg10[%c0_79, %c0_80] : memref<1x32xf32, #tpu.memory_space<vmem>>, vector<1x32xf32>
    %184 = vector.broadcast %183 : vector<1x32xf32> to vector<8x32xf32>
    %185 = arith.addf %182, %184 : vector<8x32xf32>
    %186 = arith.truncf %185 : vector<8x32xf32> to vector<8x32xbf16>
    %c0_81 = arith.constant 0 : index
    %c0_82 = arith.constant 0 : index
    %187 = vector.load %arg11[%c0_81, %c0_82] : memref<32x64xbf16, #tpu.memory_space<vmem>>, vector<32x64xbf16>
    %cst_83 = arith.constant dense<0.000000e+00> : vector<8x64xf32>
    %188 = tpu.matmul %186, %187, %cst_83 {dimension_numbers = #tpu.dot_dimension_numbers<[1], [0], [0], [1], [0, 0, 1, 1], [], []>} : vector<8x32xbf16>, vector<32x64xbf16>, vector<8x64xf32> -> vector<8x64xf32>
    %c0_84 = arith.constant 0 : index
    %c0_85 = arith.constant 0 : index
    %189 = vector.load %arg12[%c0_84, %c0_85] : memref<1x64xf32, #tpu.memory_space<vmem>>, vector<1x64xf32>
    %190 = vector.broadcast %189 : vector<1x64xf32> to vector<8x64xf32>
    %191 = arith.addf %188, %190 : vector<8x64xf32>
    %cst_86 = arith.constant 0.000000e+00 : f32
    %192 = vector.broadcast %cst_86 : f32 to vector<8x64xf32>
    %193 = arith.maximumf %191, %192 : vector<8x64xf32>
    %cst_87 = arith.constant 0.000000e+00 : f32
    %194 = vector.broadcast %cst_87 : f32 to vector<8x64xf32>
    %c0_88 = arith.constant 0 : index
    %c0_89 = arith.constant 0 : index
    %195 = vector.load %arg18[%c0_88, %c0_89] : memref<24x64xf32, #tpu.memory_space<vmem>>, vector<8x64xf32>
    tpu.vector_store %arg18[%c0_88, %c0_89], %194 {strides = array<i32>} : memref<24x64xf32, #tpu.memory_space<vmem>>, vector<8x64xf32>,
    %cst_90 = arith.constant 0.000000e+00 : f32
    %196 = vector.broadcast %cst_90 : f32 to vector<8x64xf32>
    %c16_91 = arith.constant 16 : index
    %c0_92 = arith.constant 0 : index
    %197 = vector.load %arg18[%c16_91, %c0_92] : memref<24x64xf32, #tpu.memory_space<vmem>>, vector<8x64xf32>
    tpu.vector_store %arg18[%c16_91, %c0_92], %196 {strides = array<i32>} : memref<24x64xf32, #tpu.memory_space<vmem>>, vector<8x64xf32>,
    %c8_93 = arith.constant 8 : index
    %c0_94 = arith.constant 0 : index
    %198 = vector.load %arg18[%c8_93, %c0_94] : memref<24x64xf32, #tpu.memory_space<vmem>>, vector<8x64xf32>
    tpu.vector_store %arg18[%c8_93, %c0_94], %193 {strides = array<i32>} : memref<24x64xf32, #tpu.memory_space<vmem>>, vector<8x64xf32>,
    %c7 = arith.constant 7 : index
    %c0_95 = arith.constant 0 : index
    %199 = tpu.strided_load %arg18[%c7, %c0_95] {strides = array<i32: 2, 1>} : memref<24x64xf32, #tpu.memory_space<vmem>>, vector<4x64xf32>
    %200 = arith.truncf %199 : vector<4x64xf32> to vector<4x64xbf16>
    %c8_96 = arith.constant 8 : index
    %c0_97 = arith.constant 0 : index
    %201 = tpu.strided_load %arg18[%c8_96, %c0_97] {strides = array<i32: 2, 1>} : memref<24x64xf32, #tpu.memory_space<vmem>>, vector<4x64xf32>
    %202 = arith.truncf %201 : vector<4x64xf32> to vector<4x64xbf16>
    %c9 = arith.constant 9 : index
    %c0_98 = arith.constant 0 : index
    %203 = tpu.strided_load %arg18[%c9, %c0_98] {strides = array<i32: 2, 1>} : memref<24x64xf32, #tpu.memory_space<vmem>>, vector<4x64xf32>
    %204 = arith.truncf %203 : vector<4x64xf32> to vector<4x64xbf16>
    %c0_99 = arith.constant 0 : index
    %c0_100 = arith.constant 0 : index
    %c0_101 = arith.constant 0 : index
    %205 = vector.load %arg13[%c0_99, %c0_100, %c0_101] : memref<3x64x32xbf16, #tpu.memory_space<vmem>>, vector<1x64x32xbf16>
    %206 = vector.shape_cast %205 : vector<1x64x32xbf16> to vector<64x32xbf16>
    %cst_102 = arith.constant dense<0.000000e+00> : vector<4x32xf32>
    %207 = tpu.matmul %200, %206, %cst_102 {dimension_numbers = #tpu.dot_dimension_numbers<[1], [0], [0], [1], [0, 0, 1, 1], [], []>} : vector<4x64xbf16>, vector<64x32xbf16>, vector<4x32xf32> -> vector<4x32xf32>
    %c1_103 = arith.constant 1 : index
    %c0_104 = arith.constant 0 : index
    %c0_105 = arith.constant 0 : index
    %208 = vector.load %arg13[%c1_103, %c0_104, %c0_105] : memref<3x64x32xbf16, #tpu.memory_space<vmem>>, vector<1x64x32xbf16>
    %209 = vector.shape_cast %208 : vector<1x64x32xbf16> to vector<64x32xbf16>
    %cst_106 = arith.constant dense<0.000000e+00> : vector<4x32xf32>
    %210 = tpu.matmul %202, %209, %cst_106 {dimension_numbers = #tpu.dot_dimension_numbers<[1], [0], [0], [1], [0, 0, 1, 1], [], []>} : vector<4x64xbf16>, vector<64x32xbf16>, vector<4x32xf32> -> vector<4x32xf32>
    %211 = arith.addf %207, %210 : vector<4x32xf32>
    %c2_107 = arith.constant 2 : index
    %c0_108 = arith.constant 0 : index
    %c0_109 = arith.constant 0 : index
    %212 = vector.load %arg13[%c2_107, %c0_108, %c0_109] : memref<3x64x32xbf16, #tpu.memory_space<vmem>>, vector<1x64x32xbf16>
    %213 = vector.shape_cast %212 : vector<1x64x32xbf16> to vector<64x32xbf16>
    %cst_110 = arith.constant dense<0.000000e+00> : vector<4x32xf32>
    %214 = tpu.matmul %204, %213, %cst_110 {dimension_numbers = #tpu.dot_dimension_numbers<[1], [0], [0], [1], [0, 0, 1, 1], [], []>} : vector<4x64xbf16>, vector<64x32xbf16>, vector<4x32xf32> -> vector<4x32xf32>
    %215 = arith.addf %211, %214 : vector<4x32xf32>
    %c0_111 = arith.constant 0 : index
    %c0_112 = arith.constant 0 : index
    %216 = vector.load %arg14[%c0_111, %c0_112] : memref<1x32xf32, #tpu.memory_space<vmem>>, vector<1x32xf32>
    %217 = vector.broadcast %216 : vector<1x32xf32> to vector<4x32xf32>
    %218 = arith.addf %215, %217 : vector<4x32xf32>
    %c0_113 = arith.constant 0 : index
    %c0_114 = arith.constant 0 : index
    %219 = tpu.strided_load %arg17[%c0_113, %c0_114] {strides = array<i32: 2, 1>} : memref<8x32xf32, #tpu.memory_space<vmem>>, vector<4x32xf32>
    %220 = arith.addf %219, %218 : vector<4x32xf32>
    %c0_115 = arith.constant 0 : index
    %c0_116 = arith.constant 0 : index
    %c0_117 = arith.constant 0 : index
    %221 = vector.load %arg15[%c0_115, %c0_116, %c0_117] : memref<1x4x32xf32, #tpu.memory_space<vmem>>, vector<1x4x32xf32>
    %222 = vector.shape_cast %221 : vector<1x4x32xf32> to vector<4x32xf32>
    %223 = vector.shape_cast %220 : vector<4x32xf32> to vector<1x4x32xf32>
    tpu.vector_store %arg15[%c0_115, %c0_116, %c0_117], %223 {strides = array<i32>} : memref<1x4x32xf32, #tpu.memory_space<vmem>>, vector<1x4x32xf32>,
    return
  }
  func.func @transform_0(%arg0: i32) -> (i32, i32, i32) {
    %c0_i32 = arith.constant 0 : i32
    %c0_i32_0 = arith.constant 0 : i32
    %c0_i32_1 = arith.constant 0 : i32
    return %arg0, %c0_i32, %c0_i32_0 : i32, i32, i32
  }
  func.func @transform_1(%arg0: i32) -> (i32, i32, i32) {
    %c0_i32 = arith.constant 0 : i32
    %c0_i32_0 = arith.constant 0 : i32
    %c0_i32_1 = arith.constant 0 : i32
    %c0_i32_2 = arith.constant 0 : i32
    return %c0_i32, %c0_i32_0, %c0_i32_1 : i32, i32, i32
  }
  func.func @transform_2(%arg0: i32) -> (i32, i32) {
    %c0_i32 = arith.constant 0 : i32
    %c0_i32_0 = arith.constant 0 : i32
    %c0_i32_1 = arith.constant 0 : i32
    return %c0_i32, %c0_i32_0 : i32, i32
  }
  func.func @transform_3(%arg0: i32) -> (i32, i32) {
    %c0_i32 = arith.constant 0 : i32
    %c0_i32_0 = arith.constant 0 : i32
    %c0_i32_1 = arith.constant 0 : i32
    return %c0_i32, %c0_i32_0 : i32, i32
  }
  func.func @transform_4(%arg0: i32) -> (i32, i32, i32) {
    %c0_i32 = arith.constant 0 : i32
    %c0_i32_0 = arith.constant 0 : i32
    %c0_i32_1 = arith.constant 0 : i32
    %c0_i32_2 = arith.constant 0 : i32
    return %c0_i32, %c0_i32_0, %c0_i32_1 : i32, i32, i32
  }
  func.func @transform_5(%arg0: i32) -> (i32, i32, i32) {
    %c0_i32 = arith.constant 0 : i32
    %c0_i32_0 = arith.constant 0 : i32
    %c0_i32_1 = arith.constant 0 : i32
    %c0_i32_2 = arith.constant 0 : i32
    return %c0_i32, %c0_i32_0, %c0_i32_1 : i32, i32, i32
  }
  func.func @transform_6(%arg0: i32) -> (i32, i32) {
    %c0_i32 = arith.constant 0 : i32
    %c0_i32_0 = arith.constant 0 : i32
    %c0_i32_1 = arith.constant 0 : i32
    return %c0_i32, %c0_i32_0 : i32, i32
  }
  func.func @transform_7(%arg0: i32) -> (i32, i32) {
    %c0_i32 = arith.constant 0 : i32
    %c0_i32_0 = arith.constant 0 : i32
    %c0_i32_1 = arith.constant 0 : i32
    return %c0_i32, %c0_i32_0 : i32, i32
  }
  func.func @transform_8(%arg0: i32) -> (i32, i32) {
    %c0_i32 = arith.constant 0 : i32
    %c0_i32_0 = arith.constant 0 : i32
    %c0_i32_1 = arith.constant 0 : i32
    return %c0_i32, %c0_i32_0 : i32, i32
  }
  func.func @transform_9(%arg0: i32) -> (i32, i32) {
    %c0_i32 = arith.constant 0 : i32
    %c0_i32_0 = arith.constant 0 : i32
    %c0_i32_1 = arith.constant 0 : i32
    return %c0_i32, %c0_i32_0 : i32, i32
  }
  func.func @transform_10(%arg0: i32) -> (i32, i32) {
    %c0_i32 = arith.constant 0 : i32
    %c0_i32_0 = arith.constant 0 : i32
    %c0_i32_1 = arith.constant 0 : i32
    return %c0_i32, %c0_i32_0 : i32, i32
  }
  func.func @transform_11(%arg0: i32) -> (i32, i32) {
    %c0_i32 = arith.constant 0 : i32
    %c0_i32_0 = arith.constant 0 : i32
    %c0_i32_1 = arith.constant 0 : i32
    return %c0_i32, %c0_i32_0 : i32, i32
  }
  func.func @transform_12(%arg0: i32) -> (i32, i32, i32) {
    %c0_i32 = arith.constant 0 : i32
    %c0_i32_0 = arith.constant 0 : i32
    %c0_i32_1 = arith.constant 0 : i32
    %c0_i32_2 = arith.constant 0 : i32
    return %c0_i32, %c0_i32_0, %c0_i32_1 : i32, i32, i32
  }
  func.func @transform_13(%arg0: i32) -> (i32, i32) {
    %c0_i32 = arith.constant 0 : i32
    %c0_i32_0 = arith.constant 0 : i32
    %c0_i32_1 = arith.constant 0 : i32
    return %c0_i32, %c0_i32_0 : i32, i32
  }
  func.func @transform_14(%arg0: i32) -> (i32, i32, i32) {
    %c0_i32 = arith.constant 0 : i32
    %c0_i32_0 = arith.constant 0 : i32
    %c0_i32_1 = arith.constant 0 : i32
    return %arg0, %c0_i32, %c0_i32_0 : i32, i32, i32
  }
}

</mosaic_0001>

<bundles_post_ra>
// kernel: tpu_custom_call.1
= control target key start
LH: loop header
LB: loop body
LE: loop exit
PB: predicated region body
PF: predicated region fallthrough
CT: control target
= control target key end

     0   :  { %s2608_s0 = inlined_call_operand.vmem [shape: f32[2,8,32], index: 0, kind: input, shape index: {}]   ;;  %s2609_s1 = inlined_call_operand.vmem [shape: bf16[1,8,8], index: 1, kind: input, shape index: {}]   ;;  %s2610_s2 = inlined_call_operand.vmem [shape: f32[1,32], index: 2, kind: input, shape index: {}]   ;;  %s2611_s3 = inlined_call_operand.vmem [shape: f32[1,32], index: 3, kind: input, shape index: {}]   ;;  %s2612_s4 = inlined_call_operand.vmem [shape: bf16[4,32,24], index: 4, kind: input, shape index: {}]   ;;  %s2613_s5 = inlined_call_operand.vmem [shape: f32[4,1,24], index: 5, kind: input, shape index: {}]   ;;  %s2614_s6 = inlined_call_operand.vmem [shape: bf16[32,32], index: 6, kind: input, shape index: {}]   ;;  %s2615_s7 = inlined_call_operand.vmem [shape: f32[1,32], index: 7, kind: input, shape index: {}]   ;;  %s2616_s8 = inlined_call_operand.vmem [shape: f32[1,32], index: 8, kind: input, shape index: {}]   ;;  %s2617_s9 = inlined_call_operand.vmem [shape: f32[1,32], index: 9, kind: input, shape index: {}]   ;;  %s2618_s10 = inlined_call_operand.vmem [shape: bf16[32,64], index: 10, kind: input, shape index: {}]   ;;  %s2619_s11 = inlined_call_operand.vmem [shape: f32[1,64], index: 11, kind: input, shape index: {}]   ;;  %s2620_s12 = inlined_call_operand.vmem [shape: bf16[3,64,32], index: 12, kind: input, shape index: {}]   ;;  %s2621_s13 = inlined_call_operand.vmem [shape: f32[1,32], index: 13, kind: input, shape index: {}]   ;;  %s2622_s14 = inlined_call_operand.hbm [shape: f32[2,4,32], index: 14, kind: output, shape index: {}]  }
   0x1   :  { %2623 = sst [smem:[#allocation8_spill]] %s2608_s0 }
   0x2   :  { %2624 = sst [smem:[#allocation9_spill]] %s2609_s1 }
   0x3   :  { %2625 = sst [smem:[#allocation10_spill]] %s2610_s2 }
   0x4   :  { %2626 = sst [smem:[#allocation11_spill]] %s2611_s3 }
   0x5   :  { %19 = vsyncpa [#allocation6], 0 }
   0x6   :  { %21 = vsyncpa [#allocation6 + $0x1], 0  ;;  %s2268_s29 = smov 0   ;;  %s2270_s30 = smov 0  }
   0x7   :  { %s2272_s15 = smov 0   ;;  %s2274_s16 = smov 0  }
   0x8 LB: > { %s2289_s17 = sadd.s32 4294967295, %s2183_s16   ;;  %s1747_s18 = sadd.s32 4294967294, %s2183_s16   ;;  %s2183_s16 = sphi %s2274_s16, %s2636_s16   ;;  %s2179_s15 = sphi %s2272_s15, %s2635_s15   ;;  %s2175_s30 = sphi %s2270_s30, %s2634_s30   ;;  %s2171_s29 = sphi %s2268_s29, %s2633_s29  }
   0x9   : > { %s2293_s19 = sadd.s32 1, %s2183_s16   ;;  %s333_s20 = sadd.s32 1, %s2179_s15 }
   0xa   : > { %s330_s21 = ssub.s32 %s2183_s16, %s2293_s19  ;;  %p343_p0 = scmp.ne.s32.totalorder %s2179_s15, %s2175_s30 }
   0xb   : > { %p331_p1 = scmp.eq.s32.totalorder %s330_s21, 0  ;;  %p344_p2 = scmp.eq.s32.totalorder %s2289_s17, 1 }
   0xc   : > { %p349_p3 = scmp.ne.s32.totalorder %s2175_s30, %s2171_s29  ;;  %p350_p4 = scmp.eq.s32.totalorder %s1747_s18, 1 }
   0xd   : > { %s2304_s22 = scalar_select %p331_p1, %s2179_s15, %s333_s20  }
   0xe   : > { %p2306_p5 = por %p344_p2, %p343_p0  ;;  %p2310_p6 = por %p350_p4, %p349_p3 }
   0xf   : > { %p1750_p7 = scmp.ge.s32.totalorder %s2183_s16, 1  ;;  %p414_p8 = scmp.lt.s32.totalorder %s2183_s16, 3 }
  0x11   : > { %p415_p9 = pnand %p1750_p7, %p414_p8 }
  0x12   : > { %p459_p10 = scmp.lt.s32.totalorder (!%p415_p9), %s2289_s17, 1  ;;  %vm467_vm0 = vcmask (!%p415_p9), 261120   ;;  %s2629_s0 = sld [smem:[#allocation8_spill]] (!%p415_p9)  ;;  %v2073_v7 = vld [vmem:[%s2612_s4] sm:$0xff] (!%p415_p9)   ;;  %v2185_v8 = vmov (!%p415_p9), 0.0   ;;  %vm2186_vm1 = vmmov (!%p415_p9), 0  }
  0x13   : > { %418 = sbr.rel (%p415_p9) target bundleno = 4197 (0x1065), region = 76  ;;  %1895 = vmatprep.subr.bf16.mxu1 (!%p415_p9), %v2185_v8  ;;  %1899 = vmatprep.mubr.msk.bf16.mxu1 (!%p415_p9), %vm2186_vm1, %v2185_v8  ;;  %v2074_v9 = vld [vmem:[%s2612_s4 + $0x8] sm:$0xff] (!%p415_p9)   ;;  %s2630_s2 = sld [smem:[#allocation10_spill]] (!%p415_p9)  ;;  %v1755_v25 = vld [vmem:[%s2613_s5] ss:$0 sm:$0xff] (!%p415_p9)  ;;  %vm578_vm4 = vcmask (!%p415_p9), 64512  }
  0x14   : > { %1896 = vmatpush3.bf16.msra.mxu1 (!%p415_p9), %v2073_v7  ;;  %1909 = vmatprep.subr.bf16.mxu0 (!%p415_p9), %v2185_v8  ;;  %s2631_s3 = sld [smem:[#allocation11_spill]] (!%p415_p9)  ;;  %s2188_s27 = smov (!%p415_p9), 120   ;;  %vm642_vm5 = vcmask (!%p415_p9), 1043456   ;;  %v2075_v37 = vld [vmem:[%s2612_s4 + $0x10] sm:$0xff] (!%p415_p9)   ;;  %v2076_v39 = vld [vmem:[%s2612_s4 + $0x18] sm:$0xff] (!%p415_p9)   ;;  %vm687_vm6 = vcmask (!%p415_p9), 60416  }
  0x15   : > { %1897 = vmatprep.subr.bf16.mxu1 (!%p415_p9), %v2185_v8  ;;  %1911 = vmatprep.mubr.msk.bf16.mxu0 (!%p415_p9), %vm2186_vm1, %v2185_v8  ;;  %s2632_s1 = sld [smem:[#allocation9_spill]] (!%p415_p9)  ;;  %v1766_v52 = vld [vmem:[%s2613_s5 + $0x1] ss:$0 sm:$0xff] (!%p415_p9)  ;;  %s2190_s28 = smov (!%p415_p9), 16   ;;  %vm873_vm7 = vcmask (!%p415_p9), 126016   ;;  %vm1059_vm8 = vcmask (!%p415_p9), 191616  }
  0x16   : > { %vm1245_vm9 = vcmask (!%p415_p9), 257216   ;;  %vm1421_vm12 = vcmask (!%p415_p9), 523264   ;;  %vm1672_vm13 = vcmask (!%p415_p9), 257024  }
  0x17   : > { %1422 = vst.msk [vmem:[#allocation4] sm:$0xff] (!%p415_p9), %vm1421_vm12, %v2185_v8 }
  0x18   : > { %1898 = vmatpush3.bf16.msra.mxu1 (!%p415_p9), %v2074_v9  ;;  %v2078_v9 = vld [vmem:[%s2612_s4 + $0x28] sm:$0xff] (!%p415_p9)  }
  0x19   : > { %1903 = vmatprep.subr.bf16.mxu1 (!%p415_p9), %v2185_v8  ;;  %v1753_v18 = vld [vmem:[%s2630_s2] ss:$0 sm:$0xff] (!%p415_p9) }
  0x1a   : > { %s460_s25 = scalar_select %p459_p10, %s2289_s17, 1  ;;  %v1754_v21 = vld [vmem:[%s2631_s3] ss:$0 sm:$0xff] }
  0x1b   : > { %v465_v40 = vld [vmem:[%s2632_s1] sm:$0xf] }
  0x1c   : > { %s1752_s26 = sshll.u32 %s460_s25, 3  ;;  %v2380_v41 = vunpack.c.l.bf16 %v465_v40  ;;  %s2191_s25 = smov 24  }
  0x1d   : > { %s462_s18 = scalar_lea.vmem %s2629_s0, %s1752_s26  ;;  %s2187_s26 = smov 112  }
  0x1e   : > { %v2321_v0 = vld [vmem:[%s462_s18] sm:$0xff]  ;;  %s456_s0 = sand.u32 1, %s2175_s30  }
  0x1f   : > { %v468_v1 = vsel %vm467_vm0, %v2321_v0, 0.0 }
  0x20   : > { %469 = vadd.xlane.f32.xlu0 %v468_v1 }
  0xad   : > { %v470_v2 = vpop.xlane.xlu0 %469 }
  0xae   : > { %v472_v3 = vmul.f32 0.03125, %v470_v2 }
  0xb0   : > { %v473_v4 = vsub.f32 %v2321_v0, %v472_v3 }
  0xb2   : > { %v474_v5 = vmul.f32 %v473_v4, %v473_v4  ;;  %v493_v19 = vmul.f32 %v1753_v18, %v473_v4 }
  0xb4   : > { %v475_v6 = vsel %vm467_vm0, %v474_v5, 0.0 }
  0xb5   : > { %476 = vadd.xlane.f32.xlu0 %v475_v6  ;;  %v2077_v6 = vld [vmem:[%s2612_s4 + $0x20] sm:$0xff]  }
 0x142   : > { %v477_v10 = vpop.xlane.xlu0 %476 }
 0x143   : > { %v478_v11 = vmul.f32 0.032258064, %v477_v10 }
 0x145   : > { %2097 = vrsqrt.f32 %v478_v11  ;;  %vm481_vm2 = vcmp.eq.f32.partialorder %v478_v11, inf  ;;  %v484_v14 = vand.u32 2147483648, %v478_v11  ;;  %vm483_vm3 = vcmp.eq.f32.partialorder %v478_v11, 0.0 }
 0x14f   : > { %v2098_v12 = vpop.eup %2097 }
 0x150   : > { %v480_v13 = vmul.f32 %v2098_v12, %v478_v11 }
 0x152   : > { %v482_v15 = vsel %vm481_vm2, %v478_v11, %v480_v13 }
 0x153   : > { %v485_v16 = vsel %vm483_vm3, %v484_v14, %v482_v15 }
 0x154   : > { %v494_v17 = vadd.f32 1e-06, %v485_v16 }
 0x156   : > { %2099 = vrcp.f32 %v494_v17 }
 0x160   : > { %v2100_v20 = vpop.eup %2099 }
 0x161   : > { %v496_v22 = vmul.f32 %v2100_v20, %v493_v19 }
 0x163   : > { %v504_v23 = vadd.f32 %v1754_v21, %v496_v22 }
 0x165   : > { %v2347_v24 = vpack.c.bf16 %v504_v23, %v504_v23 }
 0x167   : > { %1900 = vmatmul.mubr.msk.bf16.vlgmr.msra.gmra.mrb[0].mxu1 %vm467_vm0, %v2347_v24 }
 0x168   : > { %1905 = vmatprep.mubr.msk.bf16.mxu1 %vm2186_vm1, %v2185_v8 }
 0x23a   : > { %v566_v26 = vpop.f32.mrb[0].mxu1 }
 0x23b   : > { %v567_v27 = vadd.f32 %v1755_v25, %v566_v26  ;;  %v1901_v28 = vpop.f32.mrb[1].mxu1  ;;  %v1778_v26 = vld [vmem:[%s2613_s5 + $0x2] ss:$0 sm:$0xff] }
 0x23c   : > { %v569_v29 = vpop.f32.mrb[2].mxu1 }
 0x23d   : > { %v574_v30 = vpack.c.bf16 %v567_v27, %v567_v27  ;;  %v1902_v31 = vpop.f32.mrb[3].mxu1  ;;  %v572_v36 = vmul.f32 0.35355338, %v567_v27 }
 0x23f   : > { %637 = vrot.lane.b32.xlu0 %v574_v30, %s2187_s26  ;;  %576 = vrot.lane.b32.xlu1 %v574_v30, %s2188_s27  ;;  %v573_v38 = vpack.c.bf16 %v572_v36, %v572_v36 }
 0x2b1   : > { %v638_v32 = vpop.permute.xlu0 %637  ;;  %v577_v33 = vpop.permute.xlu1 %576 }
 0x2b2   : > { %v583_v34 = vsel %vm578_vm4, %v577_v33, 0  ;;  %v644_v35 = vsel %vm642_vm5, %v638_v32, 0 }
 0x2b3   : > { %1904 = vmatpush3.bf16.xpose.msra.mxu1 %v583_v34  ;;  %1910 = vmatpush3.bf16.msra.mxu0 %v644_v35 }
 0x2b4   : > { %1915 = vmatprep.subr.bf16.mxu1 %v2185_v8  ;;  %1923 = vmatprep.subr.bf16.mxu0 %v2185_v8 }
 0x2ba   : > { %1906 = vmatmul.mubr.msk.bf16.vlgmr.msra.gmra.mrb[4].mxu1 %vm578_vm4, %v573_v38 }
 0x2bb   : > { %1916 = vmatpush3.bf16.msra.mxu1 %v2075_v37  ;;  %1919 = vmatprep.mubr.msk.bf16.mxu1 %vm2186_vm1, %v2185_v8 }
 0x2bc   : > { %1917 = vmatprep.subr.bf16.mxu1 %v2185_v8 }
 0x2bf   : > { %1918 = vmatpush3.bf16.msra.mxu1 %v2076_v39 }
 0x2c0   : > { %1929 = vmatprep.subr.bf16.mxu1 %v2185_v8 }
 0x2c2   : > { %1920 = vmatmul.mubr.msk.bf16.vlgmr.msra.gmra.mrb[8].mxu1 %vm467_vm0, %v2347_v24 }
 0x2c3   : > { %1931 = vmatprep.mubr.msk.bf16.mxu1 %vm2186_vm1, %v2185_v8 }
 0x38d   : > { %v619_v42 = vpop.f32.mrb[4].mxu1 }
 0x38e   : > { %v620_v43 = vadd.f32 %v619_v42, %v2380_v41  ;;  %v1907_v44 = vpop.f32.mrb[5].mxu1 }
 0x38f   : > { %v622_v45 = vpop.f32.mrb[6].mxu1  ;;  %v2079_v44 = vld [vmem:[%s2612_s4 + $0x30] sm:$0xff]  }
 0x390   : > { %v1908_v46 = vpop.f32.mrb[7].mxu1  ;;  %v625_v47 = vsel %vm578_vm4, %v620_v43, -inf }
 0x391   : > { %626 = vmax.xlane.f32.xlu1 %v625_v47  ;;  %v2080_v46 = vld [vmem:[%s2612_s4 + $0x38] sm:$0xff]  }
 0x395   : > { %v748_v48 = vpop.f32.mrb[8].mxu1 }
 0x396   : > { %v1921_v49 = vpop.f32.mrb[9].mxu1  ;;  %v749_v53 = vadd.f32 %v1766_v52, %v748_v48 }
 0x397   : > { %v751_v50 = vpop.f32.mrb[10].mxu1 }
 0x398   : > { %v1922_v51 = vpop.f32.mrb[11].mxu1  ;;  %v756_v54 = vpack.c.bf16 %v749_v53, %v749_v53  ;;  %v754_v5 = vmul.f32 0.35355338, %v749_v53 }
 0x39a   : > { %v755_v7 = vpack.c.bf16 %v754_v5, %v754_v5 }
 0x3a2   : > { %818 = vrot.lane.b32.xlu1 %v756_v54, %s2187_s26 }
 0x41e   : > { %v627_v55 = vpop.xlane.xlu1 %626 }
 0x41f   : > { %v628_v56 = vsub.f32 %v620_v43, %v627_v55 }
 0x421   : > { %v629_v57 = vmul.f32 1.442695, %v628_v56 }
 0x422   : > { %v819_v58 = vpop.permute.xlu1 %818 }
 0x423   : > { %2101 = vpow2.f32 %v629_v57  ;;  %v824_v59 = vsel %vm642_vm5, %v819_v58, 0 }
 0x424   : > { %1930 = vmatpush3.bf16.msra.mxu1 %v824_v59 }
 0x425   : > { %1943 = vmatprep.subr.bf16.mxu1 %v2185_v8 }
 0x42d   : > { %v2102_v60 = vpop.eup %2101 }
 0x42e   : > { %v631_v61 = vsel %vm578_vm4, %v2102_v60, 0.0 }
 0x42f   : > { %632 = vadd.xlane.f32.xlu0 %v631_v61 }
 0x445   : > { %758 = vrot.lane.b32.xlu0 %v756_v54, %s2188_s27 }
 0x4bc   : > { %v633_v62 = vpop.xlane.xlu0 %632 }
 0x4bd   : > { %2103 = vrcp.f32 %v633_v62 }
 0x4c0   : > { %v759_v2 = vpop.permute.xlu0 %758 }
 0x4c1   : > { %v764_v4 = vsel %vm578_vm4, %v759_v2, 0  ;;  %v1790_v2 = vld [vmem:[%s2613_s5 + $0x3] ss:$0 sm:$0xff] }
 0x4c7   : > { %v2104_v63 = vpop.eup %2103 }
 0x4c8   : > { %v635_v1 = vmul.f32 %v2104_v63, %v2102_v60 }
 0x4ca   : > { %v636_v3 = vpack.c.bf16 %v635_v1, %v635_v1 }
 0x4cc   : > { %1912 = vmatmul.mubr.msk.bf16.vlgmr.msra.gmra.mrb[0].mxu0 %vm578_vm4, %v636_v3 }
 0x4cd   : > { %1924 = vmatpush3.bf16.xpose.msra.mxu0 %v764_v4  ;;  %1925 = vmatprep.mubr.msk.bf16.mxu0 %vm2186_vm1, %v2185_v8 }
 0x4ce   : > { %1935 = vmatprep.subr.bf16.mxu0 %v2185_v8 }
 0x4d4   : > { %1926 = vmatmul.mubr.msk.bf16.vlgmr.msra.gmra.mrb[4].mxu0 %vm578_vm4, %v755_v7 }
 0x4d5   : > { %1936 = vmatpush3.bf16.msra.mxu0 %v2077_v6  ;;  %1939 = vmatprep.mubr.msk.bf16.mxu0 %vm2186_vm1, %v2185_v8 }
 0x4d6   : > { %1937 = vmatprep.subr.bf16.mxu0 %v2185_v8 }
 0x4d9   : > { %1938 = vmatpush3.bf16.msra.mxu0 %v2078_v9 }
 0x4da   : > { %1949 = vmatprep.subr.bf16.mxu0 %v2185_v8 }
 0x4dc   : > { %1940 = vmatmul.mubr.msk.bf16.vlgmr.msra.gmra.mrb[8].mxu0 %vm467_vm0, %v2347_v24 }
 0x4dd   : > { %1951 = vmatprep.mubr.msk.bf16.mxu0 %vm2186_vm1, %v2185_v8 }
 0x59f   : > { %v680_v10 = vpop.f32.mrb[0].mxu0 }
 0x5a0   : > { %v686_v11 = vpack.c.bf16 %v680_v10, %v680_v10  ;;  %v1913_v12 = vpop.f32.mrb[1].mxu0 }
 0x5a1   : > { %v683_v13 = vpop.f32.mrb[2].mxu0 }
 0x5a2   : > { %688 = vst.msk [vmem:[#allocation2] sm:$0xf] %vm687_vm6, %v686_v11  ;;  %v1914_v14 = vpop.f32.mrb[3].mxu0 }
 0x5a7   : > { %v800_v15 = vpop.f32.mrb[4].mxu0 }
 0x5a8   : > { %v801_v16 = vadd.f32 %v800_v15, %v2380_v41  ;;  %v1927_v17 = vpop.f32.mrb[5].mxu0 }
 0x5a9   : > { %v803_v18 = vpop.f32.mrb[6].mxu0 }
 0x5aa   : > { %v1928_v19 = vpop.f32.mrb[7].mxu0  ;;  %v806_v20 = vsel %vm578_vm4, %v801_v16, -inf }
 0x5ab   : > { %807 = vmax.xlane.f32.xlu0 %v806_v20 }
 0x5af   : > { %v934_v21 = vpop.f32.mrb[8].mxu0 }
 0x5b0   : > { %v1941_v22 = vpop.f32.mrb[9].mxu0  ;;  %v935_v27 = vadd.f32 %v1778_v26, %v934_v21 }
 0x5b1   : > { %v937_v23 = vpop.f32.mrb[10].mxu0 }
 0x5b2   : > { %v1942_v25 = vpop.f32.mrb[11].mxu0  ;;  %v942_v28 = vpack.c.bf16 %v935_v27, %v935_v27  ;;  %v940_v43 = vmul.f32 0.35355338, %v935_v27 }
 0x5b4   : > { %v941_v45 = vpack.c.bf16 %v940_v43, %v940_v43 }
 0x5c1   : > { %1004 = vrot.lane.b32.xlu0 %v942_v28, %s2187_s26 }
 0x638   : > { %v808_v29 = vpop.xlane.xlu0 %807 }
 0x639   : > { %v809_v30 = vsub.f32 %v801_v16, %v808_v29 }
 0x63b   : > { %v810_v31 = vmul.f32 1.442695, %v809_v30 }
 0x63c   : > { %v1005_v32 = vpop.permute.xlu0 %1004 }
 0x63d   : > { %2105 = vpow2.f32 %v810_v31  ;;  %v1010_v33 = vsel %vm642_vm5, %v1005_v32, 0 }
 0x63e   : > { %1950 = vmatpush3.bf16.msra.mxu0 %v1010_v33 }
 0x63f   : > { %1963 = vmatprep.subr.bf16.mxu0 %v2185_v8 }
 0x647   : > { %v2106_v34 = vpop.eup %2105 }
 0x648   : > { %v812_v35 = vsel %vm578_vm4, %v2106_v34, 0.0 }
 0x649   : > { %813 = vadd.xlane.f32.xlu1 %v812_v35 }
 0x65a   : > { %944 = vrot.lane.b32.xlu1 %v942_v28, %s2188_s27 }
 0x6d6   : > { %v814_v36 = vpop.xlane.xlu1 %813 }
 0x6d7   : > { %2107 = vrcp.f32 %v814_v36 }
 0x6da   : > { %v945_v39 = vpop.permute.xlu1 %944 }
 0x6db   : > { %v950_v42 = vsel %vm578_vm4, %v945_v39, 0  ;;  %v2081_v39 = vld [vmem:[%s2614_s6] sm:$0xff]  }
 0x6e1   : > { %v2108_v37 = vpop.eup %2107 }
 0x6e2   : > { %v816_v38 = vmul.f32 %v2108_v37, %v2106_v34 }
 0x6e4   : > { %v817_v40 = vpack.c.bf16 %v816_v38, %v816_v38 }
 0x6e6   : > { %1932 = vmatmul.mubr.msk.bf16.vlgmr.msra.gmra.mrb[12].mxu1 %vm578_vm4, %v817_v40  ;;  %v2082_v40 = vld [vmem:[%s2614_s6 + $0x8] sm:$0xff]  }
 0x6e7   : > { %1944 = vmatpush3.bf16.xpose.msra.mxu1 %v950_v42  ;;  %1945 = vmatprep.mubr.msk.bf16.mxu1 %vm2186_vm1, %v2185_v8 }
 0x6e8   : > { %1955 = vmatprep.subr.bf16.mxu1 %v2185_v8 }
 0x6ee   : > { %1946 = vmatmul.mubr.msk.bf16.vlgmr.msra.gmra.mrb[16].mxu1 %vm578_vm4, %v941_v45 }
 0x6ef   : > { %1956 = vmatpush3.bf16.msra.mxu1 %v2079_v44  ;;  %1959 = vmatprep.mubr.msk.bf16.mxu1 %vm2186_vm1, %v2185_v8 }
 0x6f0   : > { %1957 = vmatprep.subr.bf16.mxu1 %v2185_v8 }
 0x6f3   : > { %1958 = vmatpush3.bf16.msra.mxu1 %v2080_v46 }
 0x6f4   : > { %1969 = vmatprep.subr.bf16.mxu1 %v2185_v8 }
 0x6f6   : > { %1960 = vmatmul.mubr.msk.bf16.vlgmr.msra.gmra.mrb[20].mxu1 %vm467_vm0, %v2347_v24 }
 0x6f7   : > { %1971 = vmatprep.mubr.msk.bf16.mxu1 %vm2186_vm1, %v2185_v8 }
 0x7b9   : > { %v860_v47 = vpop.f32.mrb[12].mxu1 }
 0x7ba   : > { %v1933_v48 = vpop.f32.mrb[13].mxu1  ;;  %v1843_v30 = vpack.c.bf16 %v860_v47, %v860_v47 }
 0x7bb   : > { %v863_v49 = vpop.f32.mrb[14].mxu1 }
 0x7bc   : > { %v1934_v50 = vpop.f32.mrb[15].mxu1 }
 0x7bd   : > { %v1800_v50 = vld [vmem:[%s2615_s7] ss:$0 sm:$0xff] }
 0x7c1   : > { %v986_v51 = vpop.f32.mrb[16].mxu1 }
 0x7c2   : > { %v987_v52 = vadd.f32 %v986_v51, %v2380_v41  ;;  %v1947_v53 = vpop.f32.mrb[17].mxu1 }
 0x7c3   : > { %v989_v54 = vpop.f32.mrb[18].mxu1 }
 0x7c4   : > { %v1948_v55 = vpop.f32.mrb[19].mxu1  ;;  %v992_v56 = vsel %vm578_vm4, %v987_v52, -inf }
 0x7c5   : > { %993 = vmax.xlane.f32.xlu1 %v992_v56 }
 0x7c9   : > { %v1120_v57 = vpop.f32.mrb[20].mxu1 }
 0x7ca   : > { %v1961_v58 = vpop.f32.mrb[21].mxu1  ;;  %v1121_v3 = vadd.f32 %v1790_v2, %v1120_v57 }
 0x7cb   : > { %v1123_v59 = vpop.f32.mrb[22].mxu1 }
 0x7cc   : > { %v1962_v24 = vpop.f32.mrb[23].mxu1  ;;  %v1128_v4 = vpack.c.bf16 %v1121_v3, %v1121_v3  ;;  %v1126_v12 = vmul.f32 0.35355338, %v1121_v3 }
 0x7ce   : > { %v1127_v13 = vpack.c.bf16 %v1126_v12, %v1126_v12  ;;  %v1802_v12 = vld [vmem:[%s2617_s9] ss:$0 sm:$0xff] }
 0x852   : > { %v994_v60 = vpop.xlane.xlu1 %993 }
 0x853   : > { %v995_v61 = vsub.f32 %v987_v52, %v994_v60 }
 0x855   : > { %v996_v62 = vmul.f32 1.442695, %v995_v61  ;;  %v2084_v61 = vld [vmem:[%s2618_s10 + $0x8] sm:$0xff]  }
 0x857   : > { %2109 = vpow2.f32 %v996_v62  ;;  %v2085_v62 = vld [vmem:[%s2620_s12 + $0x20] sm:$0xff]  }
 0x861   : > { %v2110_v63 = vpop.eup %2109 }
 0x862   : > { %v998_v1 = vsel %vm578_vm4, %v2110_v63, 0.0 }
 0x863   : > { %999 = vadd.xlane.f32.xlu0 %v998_v1 }
 0x879   : > { %1130 = vrot.lane.b32.xlu0 %v1128_v4, %s2188_s27  ;;  %s2189_s27 = smov 8  }
 0x8f0   : > { %v1000_v5 = vpop.xlane.xlu0 %999 }
 0x8f1   : > { %2111 = vrcp.f32 %v1000_v5 }
 0x8f4   : > { %v1131_v9 = vpop.permute.xlu0 %1130 }
 0x8f5   : > { %v1136_v11 = vsel %vm578_vm4, %v1131_v9, 0  ;;  %v1801_v9 = vld [vmem:[%s2616_s8] ss:$0 sm:$0xff] }
 0x8fb   : > { %v2112_v6 = vpop.eup %2111 }
 0x8fc   : > { %v1002_v7 = vmul.f32 %v2112_v6, %v2110_v63 }
 0x8fe   : > { %v1003_v10 = vpack.c.bf16 %v1002_v7, %v1002_v7 }
 0x900   : > { %1952 = vmatmul.mubr.msk.bf16.vlgmr.msra.gmra.mrb[12].mxu0 %vm578_vm4, %v1003_v10 }
 0x901   : > { %1964 = vmatpush3.bf16.xpose.msra.mxu0 %v1136_v11  ;;  %1965 = vmatprep.mubr.msk.bf16.mxu0 %vm2186_vm1, %v2185_v8 }
 0x902   : > { %1975 = vmatprep.subr.bf16.mxu0 %v2185_v8 }
 0x908   : > { %1966 = vmatmul.mubr.msk.bf16.vlgmr.msra.gmra.mrb[16].mxu0 %vm578_vm4, %v1127_v13 }
 0x909   : > { %1979 = vmatprep.mubr.msk.bf16.mxu0 %vm2186_vm1, %v2185_v8  ;;  %1976 = vmatpush3.bf16.msra.mxu0 %v2081_v39 }
 0x90a   : > { %1977 = vmatprep.subr.bf16.mxu0 %v2185_v8 }
 0x90d   : > { %1978 = vmatpush3.bf16.msra.mxu0 %v2082_v40 }
 0x90e   : > { %1991 = vmatprep.subr.bf16.mxu0 %v2185_v8 }
 0x9d3   : > { %v1046_v14 = vpop.f32.mrb[12].mxu0 }
 0x9d4   : > { %v1953_v15 = vpop.f32.mrb[13].mxu0 }
 0x9d5   : > { %v1049_v16 = vpop.f32.mrb[14].mxu0 }
 0x9d6   : > { %v1954_v17 = vpop.f32.mrb[15].mxu0  ;;  %v2086_v16 = vld [vmem:[%s2620_s12] sm:$0xff]  }
 0x9d7   : > { %v2087_v17 = vld [vmem:[%s2620_s12 + $0x28] sm:$0xff]  }
 0x9db   : > { %v1172_v18 = vpop.f32.mrb[16].mxu0 }
 0x9dc   : > { %v1173_v19 = vadd.f32 %v1172_v18, %v2380_v41  ;;  %v1967_v20 = vpop.f32.mrb[17].mxu0  ;;  %v1844_v41 = vpack.c.bf16 %v1046_v14, %v1046_v14  ;;  %v2088_v18 = vld [vmem:[%s2620_s12 + $0x8] sm:$0xff]  }
 0x9dd   : > { %v1175_v21 = vpop.f32.mrb[18].mxu0  ;;  %v2090_v20 = vld [vmem:[%s2620_s12 + $0x10] sm:$0xff]  }
 0x9de   : > { %v1968_v22 = vpop.f32.mrb[19].mxu0  ;;  %v1178_v23 = vsel %vm578_vm4, %v1173_v19, -inf  ;;  %v2091_v21 = vld [vmem:[%s2620_s12 + $0x38] sm:$0xff]  }
 0x9df   : > { %1179 = vmax.xlane.f32.xlu0 %v1178_v23  ;;  %v2092_v22 = vld [vmem:[%s2620_s12 + $0x18] sm:$0xff]   ;;  %v1803_v23 = vld [vmem:[%s2619_s11] ss:$0 sm:$0xff] }
 0xa6c   : > { %v1180_v25 = vpop.xlane.xlu0 %1179 }
 0xa6d   : > { %v1181_v26 = vsub.f32 %v1173_v19, %v1180_v25  ;;  %v2089_v19 = vld [vmem:[%s2620_s12 + $0x30] sm:$0xff]  }
 0xa6f   : > { %v1182_v27 = vmul.f32 1.442695, %v1181_v26 }
 0xa71   : > { %2113 = vpow2.f32 %v1182_v27 }
 0xa7b   : > { %v2114_v28 = vpop.eup %2113 }
 0xa7c   : > { %v1184_v29 = vsel %vm578_vm4, %v2114_v28, 0.0 }
 0xa7d   : > { %1185 = vadd.xlane.f32.xlu1 %v1184_v29 }
 0xa8e   : > { %1190 = vrot.lane.b32.xlu1 %v1128_v4, %s2187_s26  ;;  %s1840_s26 = sshll.u32 %s2289_s17, 6 }
 0xa8f   : > { %s2566_s2 = scalar_lea.hbm %s2622_s14, %s1840_s26 }
 0xa92   : > { %870 = vrot.lane.b32.xlu1 %v1843_v30, %s2189_s27  ;;  %s1675_s27 = scalar_lea.sflag [#allocation6], %s456_s0 }
 0xa96   : > { %1056 = vrot.lane.b32.xlu1 %v1844_v41, %s2190_s28  ;;  %v2093_v41 = vld [vmem:[%s2620_s12 + $0x40] sm:$0xff]  }
 0xb0a   : > { %v1186_v31 = vpop.xlane.xlu1 %1185 }
 0xb0b   : > { %2115 = vrcp.f32 %v1186_v31 }
 0xb0e   : > { %v1191_v32 = vpop.permute.xlu1 %1190 }
 0xb0f   : > { %v1196_v33 = vsel %vm642_vm5, %v1191_v32, 0 }
 0xb10   : > { %1970 = vmatpush3.bf16.msra.mxu1 %v1196_v33 }
 0xb11   : > { %1983 = vmatprep.subr.bf16.mxu1 %v2185_v8 }
 0xb12   : > { %v871_v34 = vpop.permute.xlu1 %870 }
 0xb13   : > { %874 = vst.msk [vmem:[#allocation2] sm:$0xf] %vm873_vm7, %v871_v34 }
 0xb15   : > { %v2116_v35 = vpop.eup %2115 }
 0xb16   : > { %v1188_v36 = vmul.f32 %v2116_v35, %v2114_v28  ;;  %v1057_v37 = vpop.permute.xlu1 %1056  ;;  %v2094_v35 = vld [vmem:[%s2620_s12 + $0x48] sm:$0xff]  }
 0xb17   : > { %1060 = vst.msk [vmem:[#allocation2] sm:$0xf] %vm1059_vm8, %v1057_v37  ;;  %v2096_v37 = vld [vmem:[%s2620_s12 + $0x58] sm:$0xff]  }
 0xb18   : > { %v1189_v38 = vpack.c.bf16 %v1188_v36, %v1188_v36  ;;  %v2095_v36 = vld [vmem:[%s2620_s12 + $0x50] sm:$0xff]  }
 0xb1a   : > { %1972 = vmatmul.mubr.msk.bf16.vlgmr.msra.gmra.mrb[24].mxu1 %vm578_vm4, %v1189_v38 }
 0xb1b   : > { %1987 = vmatprep.mubr.msk.bf16.mxu1 %vm2186_vm1, %v2185_v8 }
 0xbed   : > { %v1232_v42 = vpop.f32.mrb[24].mxu1 }
 0xbee   : > { %v1845_v43 = vpack.c.bf16 %v1232_v42, %v1232_v42  ;;  %v1973_v44 = vpop.f32.mrb[25].mxu1 }
 0xbef   : > { %v1235_v45 = vpop.f32.mrb[26].mxu1 }
 0xbf0   : > { %1242 = vrot.lane.b32.xlu0 %v1845_v43, %s2191_s25  ;;  %v1974_v46 = vpop.f32.mrb[27].mxu1  ;;  %s1751_s25 = sshll.u32 %s456_s0, 2 }
 0xbf1   : > { %s458_s18 = scalar_lea.vmem [#allocation5], %s1751_s25  ;;  %s2192_s25 = smov [#allocation5]  }
 0xbf2   : > { %s1688_s20 = sshll.u32 %s458_s18, 4  ;;  %s2125_s28 = sshll.u32 %s2192_s25, 4  ;;  %s2568_s20 = int_to_ptr.vmem [resolvable:$true] %s1688_s20  ;;  %s2126_s28 = int_to_ptr.vmem [resolvable:$false] %s2125_s28 }
 0xbf3   : > { %s2121_s17 = scalar_lea.vmem %s2568_s20, 64  ;;  %s2127_s3 = scalar_lea.vmem %s2126_s28, 128 }
 0xbf4   : > { %p2122_p11 = scmp.ne.s32.totalorder %s2568_s20, %s2121_s17  ;;  %p2128_p0 = scmp.lt.s32.totalorder %s2568_s20, %s2126_s28 }
 0xbf5   : > { %p2129_p1 = scmp.lt.s32.totalorder %s2127_s3, %s2121_s17 }
 0xbf6   : > { %p2123_p12 = pnand %p2122_p11, %p2306_p5 }
 0xbf7   : > { %p2130_p2 = por %p2129_p1, %p2128_p0 }
 0xbf8   : > { %p2124_p13 = pneg %p2123_p12 }
 0xbfa   : > { %p2131_p3 = pnand %p2130_p2, %p2124_p13 }
 0xc62   : > { %v1243_v47 = vpop.permute.xlu0 %1242 }
 0xc63   : > { %1246 = vst.msk [vmem:[#allocation2] sm:$0xf] %vm1245_vm9, %v1243_v47 }
 0xc6a   : > { %v1247_v48 = vld [vmem:[#allocation2] sm:$0xf] }
 0xc6b   : > { %1980 = vmatmul.mubr.msk.bf16.vlgmr.msra.gmra.mrb[20].mxu0 %vm467_vm0, %v1247_v48 }
 0xc6c   : > { %1999 = vmatprep.mubr.msk.bf16.mxu0 %vm2186_vm1, %v2185_v8  ;;  %1992 = vmatpush3.bf16.msra.mxu0 %v2085_v62 }
 0xc6d   : > { %1993 = vmatprep.subr.bf16.mxu0 %v2185_v8 }
 0xc70   : > { %1994 = vmatpush3.bf16.msra.mxu0 %v2087_v17 }
 0xc71   : > { %1995 = vmatprep.subr.bf16.mxu0 %v2185_v8 }
 0xc74   : > { %1996 = vmatpush3.bf16.msra.mxu0 %v2089_v19 }
 0xc75   : > { %1997 = vmatprep.subr.bf16.mxu0 %v2185_v8 }
 0xc78   : > { %1998 = vmatpush3.bf16.msra.mxu0 %v2091_v21 }
 0xc79   : > { %2015 = vmatprep.subr.bf16.mxu0 %v2185_v8 }
 0xd3e   : > { %v1301_v49 = vpop.f32.mrb[20].mxu0 }
 0xd3f   : > { %v1307_v51 = vadd.f32 %v1301_v49, %v2321_v0  ;;  %v1981_v52 = vpop.f32.mrb[21].mxu0  ;;  %v2083_v0 = vld [vmem:[%s2618_s10] sm:$0xff]  }
 0xd40   : > { %v1304_v53 = vpop.f32.mrb[22].mxu0  ;;  %1984 = vmatpush3.bf16.msra.mxu1 %v2083_v0 }
 0xd41   : > { %v1315_v54 = vadd.f32 %v1800_v50, %v1307_v51  ;;  %v1982_v55 = vpop.f32.mrb[23].mxu0  ;;  %1985 = vmatprep.subr.bf16.mxu1 %v2185_v8 }
 0xd43   : > { %1316 = vst.msk [vmem:[#allocation3] sm:$0xff] %vm467_vm0, %v1315_v54  ;;  %v1317_v56 = vsel %vm467_vm0, %v1315_v54, 0.0 }
 0xd44   : > { %1318 = vadd.xlane.f32.xlu1 %v1317_v56  ;;  %1986 = vmatpush3.bf16.msra.mxu1 %v2084_v61 }
 0xd45   : > { %2003 = vmatprep.subr.bf16.mxu1 %v2185_v8 }
 0xd4a   : > { %v1670_v56 = vld [vmem:[#allocation3] ss:$2 sm:$0xf] }
 0xdd1   : > { %v1319_v57 = vpop.xlane.xlu1 %1318 }
 0xdd2   : > { %v1320_v58 = vmul.f32 0.03125, %v1319_v57 }
 0xdd4   : > { %v1321_v59 = vsub.f32 %v1315_v54, %v1320_v58 }
 0xdd6   : > { %v1322_v24 = vmul.f32 %v1321_v59, %v1321_v59  ;;  %v1341_v10 = vmul.f32 %v1801_v9, %v1321_v59 }
 0xdd8   : > { %v1323_v60 = vsel %vm467_vm0, %v1322_v24, 0.0 }
 0xdd9   : > { %1324 = vadd.xlane.f32.xlu0 %v1323_v60 }
 0xe66   : > { %v1325_v63 = vpop.xlane.xlu0 %1324 }
 0xe67   : > { %v1326_v1 = vmul.f32 0.032258064, %v1325_v63 }
 0xe69   : > { %2117 = vrsqrt.f32 %v1326_v1  ;;  %vm1329_vm10 = vcmp.eq.f32.partialorder %v1326_v1, inf  ;;  %v1332_v4 = vand.u32 2147483648, %v1326_v1  ;;  %vm1331_vm11 = vcmp.eq.f32.partialorder %v1326_v1, 0.0 }
 0xe73   : > { %v2118_v2 = vpop.eup %2117 }
 0xe74   : > { %v1328_v3 = vmul.f32 %v2118_v2, %v1326_v1 }
 0xe76   : > { %v1330_v5 = vsel %vm1329_vm10, %v1326_v1, %v1328_v3 }
 0xe77   : > { %v1333_v6 = vsel %vm1331_vm11, %v1332_v4, %v1330_v5 }
 0xe78   : > { %v1342_v7 = vadd.f32 1e-06, %v1333_v6 }
 0xe7a   : > { %2119 = vrcp.f32 %v1342_v7 }
 0xe84   : > { %v2120_v11 = vpop.eup %2119 }
 0xe85   : > { %v1344_v13 = vmul.f32 %v2120_v11, %v1341_v10 }
 0xe87   : > { %v1352_v14 = vadd.f32 %v1802_v12, %v1344_v13 }
 0xe89   : > { %v1353_v15 = vpack.c.bf16 %v1352_v14, %v1352_v14 }
 0xe8b   : > { %1988 = vmatmul.mubr.msk.bf16.vlgmr.msra.gmra.mrb[28].mxu1 %vm467_vm0, %v1353_v15 }
 0xe8c   : > { %2011 = vmatprep.mubr.msk.bf16.mxu1 %vm2186_vm1, %v2185_v8  ;;  %2004 = vmatpush3.bf16.msra.mxu1 %v2086_v16 }
 0xe8d   : > { %2005 = vmatprep.subr.bf16.mxu1 %v2185_v8 }
 0xe90   : > { %2006 = vmatpush3.bf16.msra.mxu1 %v2088_v18 }
 0xe91   : > { %2007 = vmatprep.subr.bf16.mxu1 %v2185_v8 }
 0xe94   : > { %2008 = vmatpush3.bf16.msra.mxu1 %v2090_v20 }
 0xe95   : > { %2009 = vmatprep.subr.bf16.mxu1 %v2185_v8 }
 0xe98   : > { %2010 = vmatpush3.bf16.msra.mxu1 %v2092_v22 }
 0xf5e   : > { %v1414_v25 = vpop.f32.mrb[28].mxu1 }
 0xf5f   : > { %v1415_v26 = vadd.f32 %v1803_v23, %v1414_v25  ;;  %v1989_v27 = vpop.f32.mrb[29].mxu1 }
 0xf60   : > { %v1417_v28 = vpop.f32.mrb[30].mxu1 }
 0xf61   : > { %v1420_v29 = vmax.f32 %v1415_v26, 0.0  ;;  %v1990_v30 = vpop.f32.mrb[31].mxu1 }
 0xf63   : > { %1424 = vst.msk [vmem:[#allocation4 + $0x8] sm:$0xff] %vm1421_vm12, %v1420_v29 }
 0xf6a   : > { %v1429_v31 = vld [vmem:[#allocation4 + $0x8] ss:$2 sm:$0xf]  ;;  %v1426_v32 = vld [vmem:[#allocation4 + $0x7] ss:$2 sm:$0xf] }
 0xf6b   : > { %v1430_v33 = vpack.c.bf16 %v1429_v31, %v1429_v31  ;;  %v1427_v34 = vpack.c.bf16 %v1426_v32, %v1426_v32  ;;  %v1432_v38 = vld [vmem:[#allocation4 + $0x9] ss:$2 sm:$0xf] }
 0xf6c   : > { %v1433_v39 = vpack.c.bf16 %v1432_v38, %v1432_v38 }
 0xf6d   : > { %2000 = vmatmul.mubr.msk.bf16.vlgmr.msra.gmra.mrb[24].mxu0 %vm1421_vm12, %v1430_v33  ;;  %2012 = vmatmul.mubr.msk.bf16.vlgmr.msra.gmra.mrb[32].mxu1 %vm1421_vm12, %v1427_v34 }
 0xf6e   : > { %2016 = vmatpush3.bf16.msra.mxu0 %v2093_v41  ;;  %2023 = vmatprep.mubr.msk.bf16.mxu0 %vm2186_vm1, %v2185_v8 }
 0xf6f   : > { %2017 = vmatprep.subr.bf16.mxu0 %v2185_v8 }
 0xf72   : > { %2018 = vmatpush3.bf16.msra.mxu0 %v2094_v35 }
 0xf73   : > { %2019 = vmatprep.subr.bf16.mxu0 %v2185_v8 }
 0xf76   : > { %2020 = vmatpush3.bf16.msra.mxu0 %v2095_v36 }
 0xf77   : > { %2021 = vmatprep.subr.bf16.mxu0 %v2185_v8  ;;  %v1838_v8 = vld [vmem:[%s2621_s13] ss:$0 sm:$0xff] }
 0xf7a   : > { %2022 = vmatpush3.bf16.msra.mxu0 %v2096_v37 }
 0xf7d   : > { %2024 = vmatmul.mubr.msk.bf16.vlgmr.msra.gmra.mrb[28].mxu0 %vm1421_vm12, %v1433_v39 }
0x1040   : > { %v1512_v40 = vpop.f32.mrb[24].mxu0  ;;  %v1579_v42 = vpop.f32.mrb[32].mxu1 }
0x1041   : > { %v1580_v43 = vadd.f32 %v1579_v42, %v1512_v40  ;;  %v2001_v44 = vpop.f32.mrb[25].mxu0  ;;  %v2013_v45 = vpop.f32.mrb[33].mxu1 }
0x1042   : > { %v1515_v46 = vpop.f32.mrb[26].mxu0  ;;  %v1582_v47 = vpop.f32.mrb[34].mxu1 }
0x1043   : > { %v2002_v48 = vpop.f32.mrb[27].mxu0  ;;  %v2014_v49 = vpop.f32.mrb[35].mxu1 }
0x1050   : > { %v1655_v50 = vpop.f32.mrb[28].mxu0 }
0x1051   : > { %v1661_v51 = vadd.f32 %v1655_v50, %v1580_v43  ;;  %v2025_v52 = vpop.f32.mrb[29].mxu0 }
0x1052   : > { %v1658_v53 = vpop.f32.mrb[30].mxu0 }
0x1053   : > { %v1669_v54 = vadd.f32 %v1838_v8, %v1661_v51  ;;  %v2026_v55 = vpop.f32.mrb[31].mxu0 }
0x1055   : > { %v1671_v57 = vadd.f32 %v1670_v56, %v1669_v54 }
0x1057   : > { %1673 = vst.msk [vmem:[%s458_s18] sm:$0xf] %vm1672_vm13, %v1671_v57 }
0x1058   : > { %2134 = shalt.err (!%p2131_p3)
}
0x1059   : > { %s2135_s1 = scalar_lea.hbm %s2566_s2, 64  ;;  %s2139_s18 = scalar_lea.hbm %s2622_s14, 128 }
0x105a   : > { %p2136_p4 = scmp.ne.s32.totalorder %s2566_s2, %s2135_s1  ;;  %p2140_p9 = scmp.lt.u32.totalorder %s2566_s2, %s2622_s14 }
0x105b   : > { %p2141_p10 = scmp.lt.u32.totalorder %s2139_s18, %s2135_s1  ;;  %p2143_p12 = scmp.lt.u32.totalorder %s2135_s1, %s2566_s2 }
0x105c   : > { %p2137_p7 = pnand %p2136_p4, %p2306_p5 }
0x105d   : > { %p2142_p11 = por %p2141_p10, %p2140_p9 }
0x105e   : > { %p2138_p8 = pneg %p2137_p7 }
0x105f   : > { %p2144_p13 = por %p2143_p12, %p2142_p11 }
0x1061   : > { %p2145_p0 = pnand %p2144_p13, %p2138_p8 }
0x1063   : > { %2148 = shalt.err (!%p2145_p0)
}
0x1064   : > { %2027 = dma.vmem_to_hbm [thread:$0]  (%p2306_p5), %s2568_s20, 64, %s2566_s2, %s1675_s27  }
0x1065 PF: > { %p2033_p1 = scmp.ge.s32.totalorder %s2183_s16, 2  ;;  %s1700_s3 = sand.u32 1, %s2171_s29  }
0x1066   : > { %s1701_s17 = scalar_lea.sflag [#allocation6], %s1700_s3 }
0x1067   : > { %p2030_p2 = pnand %p2033_p1, %p2310_p6 }
0x1069   : > { %2166 = dma.done.wait (!%p2030_p2), %s1701_s17, 64  }
0x106a   : > { %2168 = vsyncadd (!%p2030_p2), %s1701_s17, 4294967232  ;;  %p24_p3 = scmp.ge.s32.totalorder %s2293_s19, 4   ;;  %s2633_s29 = smov %s2175_s30 }
0x106b   : > { %s2634_s30 = smov %s2179_s15  ;;  %s2635_s15 = smov %s2304_s22 }
0x106c   : > { %s2636_s16 = smov %s2293_s19  ;;  %26 = sbr.rel (!%p24_p3) target bundleno = 8 (0x8), region = 122 }
0x1073   :  { %1706 = vsyncpa [#allocation6], 1 }
0x1074   :  { %1708 = vsyncpa [#allocation6 + $0x1], 1 }

</bundles_post_ra>
